<compile_context>
chip_gen: v7x
topology: tpu7x:2x2x1
jax: 0.10.0
libtpu: 0.0.40
codegen_flags: <defaults>
</compile_context>

<pallas_src>
import functools

import jax
import jax.numpy as jnp
from jax.experimental import pallas as pl
from jax.experimental.pallas import tpu as pltpu


_CMID = 32        # per-head hidden channels (module: channel = 32)
_CMID_PAD = 128   # fused + lane-padded hidden channels (cls 32 | reg 32 | 0)
_COUT_PAD = 128   # lane-dense padded output channels   (cls 12 | reg 36 | 0)


# ----------------------------------------------------------------------------
# Pallas kernel: fused Classification + SingleRegression heads, one image
# (batch element) per grid step.
# ----------------------------------------------------------------------------
def _fused_head_kernel(xp_ref, w1_ref, scale_ref, bias_ref, w2_ref, b2_ref,
                       o_ref, *, H, W, Cin):
    # xp_ref   : (1, H+2, W+2, Cin) bf16  zero-padded NHWC input tile
    # w1_ref   : (9*Cin, 128)       bf16  fused 3x3 weights (cls | reg | 0-pad)
    # scale_ref: (1, 128)           f32   folded BN scale (conv1 bias folded)
    # bias_ref : (1, 128)           f32   folded BN bias
    # w2_ref   : (128, 128)         bf16  block-diagonal fused 1x1 weights
    # b2_ref   : (1, 128)           f32   fused 1x1 bias (lane-padded)
    # o_ref    : (1, H*W, 128)      f32   lane-dense output slab
    xp = xp_ref[0].astype(jnp.float32)            # (H+2, W+2, Cin)

    # im2col: build the (H*W, 9*Cin) patch matrix ONCE, shared by both heads.
    patch = jnp.concatenate(
        [xp[dy:dy + H, dx:dx + W, :].reshape(H * W, Cin)
         for dy in range(3) for dx in range(3)], axis=1)

    # Both 3x3 convs as one K=9*Cin MXU matmul (bf16 operands, f32 accumulate).
    acc = jnp.dot(patch.astype(jnp.bfloat16), w1_ref[...],
                  preferred_element_type=jnp.float32)          # (H*W, 128)

    # Folded eval-mode BatchNorm + ReLU (f32, VPU).
    h = jnp.maximum(acc * scale_ref[0] + bias_ref[0], 0.0)

    # Both 1x1 convs as one block-diagonal matmul; lane-dense 128-wide output.
    out = jnp.dot(h.astype(jnp.bfloat16), w2_ref[...],
                  preferred_element_type=jnp.float32) + b2_ref[0]
    o_ref[0] = out


def fused_heads(x_nhwc, cls_params, reg_params, eps=1e-5):
    """Fused ClassificationHead + SingleRegressionHead forward.

    Returns a lane-dense (B, H*W, 128) f32 slab whose channel layout is
    [cls_cout | loc_cout | zeros], plus the two real channel counts.
    """
    B, H, W, Cin = x_nhwc.shape
    cls_cout = cls_params["w2"].shape[-1]
    loc_cout = reg_params["w2"].shape[-1]
    assert cls_params["w1"].shape[-1] == _CMID == reg_params["w1"].shape[-1]
    assert cls_cout + loc_cout <= _COUT_PAD

    def fold_bn(p):
        s = p["gamma"] / jnp.sqrt(p["var"] + eps)
        return s, (p["b1"] - p["mean"]) * s + p["beta"]

    s_c, t_c = fold_bn(cls_params)
    s_r, t_r = fold_bn(reg_params)

    # Fused conv1 weights: (3,3,Cin,128) -> flatten K=(dy,dx,cin) -> (9*Cin,128)
    w1 = jnp.zeros((3, 3, Cin, _CMID_PAD), jnp.float32)
    w1 = w1.at[..., :_CMID].set(cls_params["w1"])
    w1 = w1.at[..., _CMID:2 * _CMID].set(reg_params["w1"])
    w1 = w1.reshape(9 * Cin, _CMID_PAD).astype(jnp.bfloat16)

    scale = jnp.zeros((1, _CMID_PAD), jnp.float32)
    scale = scale.at[0, :_CMID].set(s_c).at[0, _CMID:2 * _CMID].set(s_r)
    bias = jnp.zeros((1, _CMID_PAD), jnp.float32)
    bias = bias.at[0, :_CMID].set(t_c).at[0, _CMID:2 * _CMID].set(t_r)

    # Block-diagonal fused 1x1 weights and lane-padded bias.
    w2 = jnp.zeros((_CMID_PAD, _COUT_PAD), jnp.float32)
    w2 = w2.at[:_CMID, :cls_cout].set(cls_params["w2"])
    w2 = w2.at[_CMID:2 * _CMID,
               cls_cout:cls_cout + loc_cout].set(reg_params["w2"])
    w2 = w2.astype(jnp.bfloat16)
    b2 = jnp.zeros((1, _COUT_PAD), jnp.float32)
    b2 = b2.at[0, :cls_cout].set(cls_params["b2"])
    b2 = b2.at[0, cls_cout:cls_cout + loc_cout].set(reg_params["b2"])

    # SAME padding once in the (jit-fused) wrapper; DMA the input in bf16.
    xp = jnp.pad(x_nhwc, ((0, 0), (1, 1), (1, 1), (0, 0))).astype(jnp.bfloat16)

    kern = functools.partial(_fused_head_kernel, H=H, W=W, Cin=Cin)
    out = pl.pallas_call(
        kern,
        out_shape=jax.ShapeDtypeStruct((B, H * W, _COUT_PAD), jnp.float32),
        grid=(B,),
        in_specs=[
            pl.BlockSpec((1, H + 2, W + 2, Cin), lambda b: (b, 0, 0, 0)),
            pl.BlockSpec((9 * Cin, _CMID_PAD), lambda b: (0, 0)),
            pl.BlockSpec((1, _CMID_PAD), lambda b: (0, 0)),
            pl.BlockSpec((1, _CMID_PAD), lambda b: (0, 0)),
            pl.BlockSpec((_CMID_PAD, _COUT_PAD), lambda b: (0, 0)),
            pl.BlockSpec((1, _COUT_PAD), lambda b: (0, 0)),
        ],
        out_specs=pl.BlockSpec((1, H * W, _COUT_PAD), lambda b: (b, 0, 0)),
        compiler_params=pltpu.CompilerParams(
            dimension_semantics=("parallel",)),
    )(xp, w1, scale, bias, w2, b2)
    return out, cls_cout, loc_cout


# ----------------------------------------------------------------------------
# Pure-JAX f32 reference of one head (for correctness checking).
# ----------------------------------------------------------------------------
def _ref_head(x_nhwc, w1, b1, gamma, beta, mean, var, w2, b2, eps=1e-5):
    y = jax.lax.conv_general_dilated(
        x_nhwc, w1, window_strides=(1, 1), padding="SAME",
        dimension_numbers=("NHWC", "HWIO", "NHWC"))
    y = y + b1
    y = gamma * (y - mean) / jnp.sqrt(var + eps) + beta
    y = jnp.maximum(y, 0.0)
    y = jnp.einsum("bhwc,cd->bhwd", y, w2) + b2
    return y


# ----------------------------------------------------------------------------
# FaFMIMONet head wrapper (classification + regression + output reshaping).
# ----------------------------------------------------------------------------
class Config:
    category_num = 2
    anchor_size = [0, 1, 2, 3, 4, 5]   # 6 anchors per location
    box_code_size = 6
    only_det = True
    binary = True
    use_map = False
    use_vis = False
    motion_state = False


def init_head_params(key, cin, cmid, cout):
    k = jax.random.split(key, 8)
    w1 = jax.random.normal(k[0], (3, 3, cin, cmid), jnp.float32) * 0.05
    b1 = jax.random.normal(k[1], (cmid,), jnp.float32) * 0.05
    gamma = 1.0 + 0.1 * jax.random.normal(k[2], (cmid,), jnp.float32)
    beta = 0.1 * jax.random.normal(k[3], (cmid,), jnp.float32)
    mean = 0.1 * jax.random.normal(k[4], (cmid,), jnp.float32)
    var = jnp.abs(1.0 + 0.1 * jax.random.normal(k[5], (cmid,), jnp.float32))
    w2 = jax.random.normal(k[6], (cmid, cout), jnp.float32) * 0.05
    b2 = jax.random.normal(k[7], (cout,), jnp.float32) * 0.05
    return dict(w1=w1, b1=b1, gamma=gamma, beta=beta, mean=mean, var=var,
                w2=w2, b2=b2)


def faf_heads_forward(x_nchw, cls_params, reg_params, config=Config):
    """Mirrors: cls_preds = classification(x); loc_preds = regression(x) and
    the permute/view glue of FaFMIMONet_64_128_128.forward."""
    B, C, H, W = x_nchw.shape
    anchor = len(config.anchor_size)
    cat = config.category_num
    box = config.box_code_size
    seq = 1 if config.only_det else config.pred_len

    x_nhwc = jnp.transpose(x_nchw, (0, 2, 3, 1))  # NCHW -> NHWC

    out, cls_cout, loc_cout = fused_heads(x_nhwc, cls_params, reg_params)

    cls_out = out[:, :, :cls_cout].reshape(B, H, W, cls_cout)
    loc_out = out[:, :, cls_cout:cls_cout + loc_cout].reshape(B, H, W, loc_cout)

    # cls_preds.permute(0,2,3,1).view(B, -1, category_num)  (already NHWC here)
    cls_preds = cls_out.reshape(B, -1, cat)
    # loc_preds.permute(0,2,3,1).view(-1, H, W, anchor, out_seq_len, box)
    # NOTE: with out_seq_len > 1 the (anchor, seq, box) channel ordering of the
    # PyTorch view must be re-verified; with only_det=True (seq=1) it is exact.
    loc_preds = loc_out.reshape(-1, H, W, anchor, seq, box)
    return {"loc": loc_preds, "cls": cls_preds}, (cls_out, loc_out, x_nhwc)


if __name__ == "__main__":
    cfg = Config
    B, C, H, W = 2, 32, 16, 16            # channel=32 as in the module heads
    anchor = len(cfg.anchor_size)
    cls_cout = cfg.category_num * anchor          # 12
    loc_cout = anchor * cfg.box_code_size * 1     # 36

    key = jax.random.PRNGKey(0)
    kx, kc, kr = jax.random.split(key, 3)
    x = jax.random.normal(kx, (B, C, H, W), jnp.float32)   # NCHW like PyTorch

    cls_params = init_head_params(kc, C, 32, cls_cout)
    reg_params = init_head_params(kr, C, 32, loc_cout)

    fwd = jax.jit(lambda xx, cp, rp: faf_heads_forward(xx, cp, rp, Config))
    result, (cls_out, loc_out, x_nhwc) = fwd(x, cls_params, reg_params)
    jax.block_until_ready(result["cls"])
    jax.block_until_ready(result["loc"])

    # Correctness check vs. pure-JAX f32 reference (kernel uses bf16 MXU ops).
    cls_ref = _ref_head(x_nhwc, **cls_params)
    loc_ref = _ref_head(x_nhwc, **reg_params)
    assert jnp.allclose(cls_out, cls_ref, rtol=3e-2, atol=5e-2), float(
        jnp.max(jnp.abs(cls_out - cls_ref)))
    assert jnp.allclose(loc_out, loc_ref, rtol=3e-2, atol=5e-2), float(
        jnp.max(jnp.abs(loc_out - loc_ref)))
    assert result["cls"].shape == (B, H * W * anchor, cfg.category_num)
    assert result["loc"].shape == (B, H, W, anchor, 1, cfg.box_code_size)

    print("KERNEL_OK")
</pallas_src>

<mosaic_0001>
module attributes {stable_mosaic.version = 11 : i64} {
  func.func @_fused_head_kernel(%arg0: i32, %arg1: memref<1x18x18x32xbf16, #tpu.memory_space<vmem>>, %arg2: memref<288x128xbf16, #tpu.memory_space<vmem>>, %arg3: memref<1x128xf32, #tpu.memory_space<vmem>>, %arg4: memref<1x128xf32, #tpu.memory_space<vmem>>, %arg5: memref<128x128xbf16, #tpu.memory_space<vmem>>, %arg6: memref<1x128xf32, #tpu.memory_space<vmem>>, %arg7: memref<1x256x128xf32, #tpu.memory_space<vmem>>) attributes {dimension_semantics = [#tpu.dimension_semantics<parallel>], iteration_bounds = array<i64: 2>, scalar_prefetch = 0 : i64, scratch_operands = 0 : i64, tpu.core_type = #tpu.core_type<tc>, window_params = [{transform_indices = @transform_0, window_bounds = array<i64: 1, 18, 18, 32>}, {pipeline_mode = #tpu.pipeline_mode<synchronous>, transform_indices = @transform_1, window_bounds = array<i64: 288, 128>}, {pipeline_mode = #tpu.pipeline_mode<synchronous>, transform_indices = @transform_2, window_bounds = array<i64: 1, 128>}, {pipeline_mode = #tpu.pipeline_mode<synchronous>, transform_indices = @transform_3, window_bounds = array<i64: 1, 128>}, {pipeline_mode = #tpu.pipeline_mode<synchronous>, transform_indices = @transform_4, window_bounds = array<i64: 128, 128>}, {pipeline_mode = #tpu.pipeline_mode<synchronous>, transform_indices = @transform_5, window_bounds = array<i64: 1, 128>}, {transform_indices = @transform_6, window_bounds = array<i64: 1, 256, 128>}]} {
    %c0 = arith.constant 0 : index
    %c0_0 = arith.constant 0 : index
    %c0_1 = arith.constant 0 : index
    %c0_2 = arith.constant 0 : index
    %0 = vector.load %arg1[%c0, %c0_0, %c0_1, %c0_2] : memref<1x18x18x32xbf16, #tpu.memory_space<vmem>>, vector<1x18x18x32xbf16>
    %1 = vector.shape_cast %0 : vector<1x18x18x32xbf16> to vector<18x18x32xbf16>
    %2 = arith.extf %1 : vector<18x18x32xbf16> to vector<18x18x32xf32>
    %3 = vector.extract_strided_slice %2 {offsets = [0, 0, 0], sizes = [16, 16, 32], strides = [1, 1, 1]} : vector<18x18x32xf32> to vector<16x16x32xf32>
    %4 = vector.shape_cast %3 : vector<16x16x32xf32> to vector<256x32xf32>
    %5 = vector.extract_strided_slice %2 {offsets = [0, 1, 0], sizes = [16, 16, 32], strides = [1, 1, 1]} : vector<18x18x32xf32> to vector<16x16x32xf32>
    %6 = vector.shape_cast %5 : vector<16x16x32xf32> to vector<256x32xf32>
    %7 = vector.extract_strided_slice %2 {offsets = [0, 2, 0], sizes = [16, 16, 32], strides = [1, 1, 1]} : vector<18x18x32xf32> to vector<16x16x32xf32>
    %8 = vector.shape_cast %7 : vector<16x16x32xf32> to vector<256x32xf32>
    %9 = vector.extract_strided_slice %2 {offsets = [1, 0, 0], sizes = [16, 16, 32], strides = [1, 1, 1]} : vector<18x18x32xf32> to vector<16x16x32xf32>
    %10 = vector.shape_cast %9 : vector<16x16x32xf32> to vector<256x32xf32>
    %11 = vector.extract_strided_slice %2 {offsets = [1, 1, 0], sizes = [16, 16, 32], strides = [1, 1, 1]} : vector<18x18x32xf32> to vector<16x16x32xf32>
    %12 = vector.shape_cast %11 : vector<16x16x32xf32> to vector<256x32xf32>
    %13 = vector.extract_strided_slice %2 {offsets = [1, 2, 0], sizes = [16, 16, 32], strides = [1, 1, 1]} : vector<18x18x32xf32> to vector<16x16x32xf32>
    %14 = vector.shape_cast %13 : vector<16x16x32xf32> to vector<256x32xf32>
    %15 = vector.extract_strided_slice %2 {offsets = [2, 0, 0], sizes = [16, 16, 32], strides = [1, 1, 1]} : vector<18x18x32xf32> to vector<16x16x32xf32>
    %16 = vector.shape_cast %15 : vector<16x16x32xf32> to vector<256x32xf32>
    %17 = vector.extract_strided_slice %2 {offsets = [2, 1, 0], sizes = [16, 16, 32], strides = [1, 1, 1]} : vector<18x18x32xf32> to vector<16x16x32xf32>
    %18 = vector.shape_cast %17 : vector<16x16x32xf32> to vector<256x32xf32>
    %19 = vector.extract_strided_slice %2 {offsets = [2, 2, 0], sizes = [16, 16, 32], strides = [1, 1, 1]} : vector<18x18x32xf32> to vector<16x16x32xf32>
    %20 = vector.shape_cast %19 : vector<16x16x32xf32> to vector<256x32xf32>
    %21 = tpu.concatenate %4, %6, %8, %10, %12, %14, %16, %18, %20 in 1 : vector<256x32xf32>, vector<256x32xf32>, vector<256x32xf32>, vector<256x32xf32>, vector<256x32xf32>, vector<256x32xf32>, vector<256x32xf32>, vector<256x32xf32>, vector<256x32xf32> -> vector<256x288xf32>
    %22 = arith.truncf %21 : vector<256x288xf32> to vector<256x288xbf16>
    %c0_3 = arith.constant 0 : index
    %c0_4 = arith.constant 0 : index
    %23 = vector.load %arg2[%c0_3, %c0_4] : memref<288x128xbf16, #tpu.memory_space<vmem>>, vector<288x128xbf16>
    %cst = arith.constant dense<0.000000e+00> : vector<256x128xf32>
    %24 = tpu.matmul %22, %23, %cst {dimension_numbers = #tpu.dot_dimension_numbers<[1], [0], [0], [1], [0, 0, 1, 1], [], []>} : vector<256x288xbf16>, vector<288x128xbf16>, vector<256x128xf32> -> vector<256x128xf32>
    %c0_5 = arith.constant 0 : index
    %c0_6 = arith.constant 0 : index
    %25 = vector.load %arg3[%c0_5, %c0_6] : memref<1x128xf32, #tpu.memory_space<vmem>>, vector<1x128xf32>
    %26 = vector.shape_cast %25 : vector<1x128xf32> to vector<128xf32>
    %27 = vector.shape_cast %26 : vector<128xf32> to vector<1x128xf32>
    %28 = vector.broadcast %27 : vector<1x128xf32> to vector<256x128xf32>
    %29 = arith.mulf %24, %28 : vector<256x128xf32>
    %c0_7 = arith.constant 0 : index
    %c0_8 = arith.constant 0 : index
    %30 = vector.load %arg4[%c0_7, %c0_8] : memref<1x128xf32, #tpu.memory_space<vmem>>, vector<1x128xf32>
    %31 = vector.shape_cast %30 : vector<1x128xf32> to vector<128xf32>
    %32 = vector.shape_cast %31 : vector<128xf32> to vector<1x128xf32>
    %33 = vector.broadcast %32 : vector<1x128xf32> to vector<256x128xf32>
    %34 = arith.addf %29, %33 : vector<256x128xf32>
    %cst_9 = arith.constant 0.000000e+00 : f32
    %35 = vector.broadcast %cst_9 : f32 to vector<256x128xf32>
    %36 = arith.maximumf %34, %35 : vector<256x128xf32>
    %37 = arith.truncf %36 : vector<256x128xf32> to vector<256x128xbf16>
    %c0_10 = arith.constant 0 : index
    %c0_11 = arith.constant 0 : index
    %38 = vector.load %arg5[%c0_10, %c0_11] : memref<128x128xbf16, #tpu.memory_space<vmem>>, vector<128x128xbf16>
    %cst_12 = arith.constant dense<0.000000e+00> : vector<256x128xf32>
    %39 = tpu.matmul %37, %38, %cst_12 {dimension_numbers = #tpu.dot_dimension_numbers<[1], [0], [0], [1], [0, 0, 1, 1], [], []>} : vector<256x128xbf16>, vector<128x128xbf16>, vector<256x128xf32> -> vector<256x128xf32>
    %c0_13 = arith.constant 0 : index
    %c0_14 = arith.constant 0 : index
    %40 = vector.load %arg6[%c0_13, %c0_14] : memref<1x128xf32, #tpu.memory_space<vmem>>, vector<1x128xf32>
    %41 = vector.shape_cast %40 : vector<1x128xf32> to vector<128xf32>
    %42 = vector.shape_cast %41 : vector<128xf32> to vector<1x128xf32>
    %43 = vector.broadcast %42 : vector<1x128xf32> to vector<256x128xf32>
    %44 = arith.addf %39, %43 : vector<256x128xf32>
    %c0_15 = arith.constant 0 : index
    %c0_16 = arith.constant 0 : index
    %c0_17 = arith.constant 0 : index
    %45 = vector.load %arg7[%c0_15, %c0_16, %c0_17] : memref<1x256x128xf32, #tpu.memory_space<vmem>>, vector<1x256x128xf32>
    %46 = vector.shape_cast %45 : vector<1x256x128xf32> to vector<256x128xf32>
    %47 = vector.shape_cast %44 : vector<256x128xf32> to vector<1x256x128xf32>
    tpu.vector_store %arg7[%c0_15, %c0_16, %c0_17], %47 {strides = array<i32>} : memref<1x256x128xf32, #tpu.memory_space<vmem>>, vector<1x256x128xf32>,
    return
  }
  func.func @transform_0(%arg0: i32) -> (i32, i32, i32, i32) {
    %c0_i32 = arith.constant 0 : i32
    %c0_i32_0 = arith.constant 0 : i32
    %c0_i32_1 = arith.constant 0 : i32
    %c0_i32_2 = arith.constant 0 : i32
    return %arg0, %c0_i32, %c0_i32_0, %c0_i32_1 : i32, i32, i32, i32
  }
  func.func @transform_1(%arg0: i32) -> (i32, i32) {
    %c0_i32 = arith.constant 0 : i32
    %c0_i32_0 = arith.constant 0 : i32
    %c0_i32_1 = arith.constant 0 : i32
    return %c0_i32, %c0_i32_0 : i32, i32
  }
  func.func @transform_2(%arg0: i32) -> (i32, i32) {
    %c0_i32 = arith.constant 0 : i32
    %c0_i32_0 = arith.constant 0 : i32
    %c0_i32_1 = arith.constant 0 : i32
    return %c0_i32, %c0_i32_0 : i32, i32
  }
  func.func @transform_3(%arg0: i32) -> (i32, i32) {
    %c0_i32 = arith.constant 0 : i32
    %c0_i32_0 = arith.constant 0 : i32
    %c0_i32_1 = arith.constant 0 : i32
    return %c0_i32, %c0_i32_0 : i32, i32
  }
  func.func @transform_4(%arg0: i32) -> (i32, i32) {
    %c0_i32 = arith.constant 0 : i32
    %c0_i32_0 = arith.constant 0 : i32
    %c0_i32_1 = arith.constant 0 : i32
    return %c0_i32, %c0_i32_0 : i32, i32
  }
  func.func @transform_5(%arg0: i32) -> (i32, i32) {
    %c0_i32 = arith.constant 0 : i32
    %c0_i32_0 = arith.constant 0 : i32
    %c0_i32_1 = arith.constant 0 : i32
    return %c0_i32, %c0_i32_0 : i32, i32
  }
  func.func @transform_6(%arg0: i32) -> (i32, i32, i32) {
    %c0_i32 = arith.constant 0 : i32
    %c0_i32_0 = arith.constant 0 : i32
    %c0_i32_1 = arith.constant 0 : i32
    return %arg0, %c0_i32, %c0_i32_0 : i32, i32, i32
  }
}

</mosaic_0001>

<bundles_post_ra>
// kernel: _lambda_.1
= control target key start
LH: loop header
LB: loop body
LE: loop exit
PB: predicated region body
PF: predicated region fallthrough
CT: control target
= control target key end

     0   :  { %s3341_s21 = smov 0   ;;  %s4561_s0 = inlined_call_operand.vmem [shape: bf16[2,18,18,32], index: 0, kind: input, shape index: {}]   ;;  %s4562_s1 = inlined_call_operand.vmem [shape: bf16[288,128], index: 1, kind: input, shape index: {}]   ;;  %s4563_s2 = inlined_call_operand.vmem [shape: f32[1,128], index: 2, kind: input, shape index: {}]   ;;  %s4564_s3 = inlined_call_operand.vmem [shape: f32[1,128], index: 3, kind: input, shape index: {}]   ;;  %s4565_s4 = inlined_call_operand.vmem [shape: bf16[128,128], index: 4, kind: input, shape index: {}]   ;;  %s4566_s5 = inlined_call_operand.vmem [shape: f32[1,128], index: 5, kind: input, shape index: {}]   ;;  %s4567_s6 = inlined_call_operand.vmem [shape: f32[2,256,128], index: 6, kind: output, shape index: {}]  }
   0x1 LB: > { %s2439_s22 = sadd.s32 4294967295, %s3301_s21   ;;  %p2443_p0 = scmp.ge.s32.totalorder %s3301_s21, 1  ;;  %s3301_s21 = sphi %s3341_s21, %s16_s21  }
   0x2   : > { %p212_p1 = scmp.lt.s32.totalorder %s3301_s21, 3 }
   0x4   : > { %p213_p2 = pnand %p2443_p0, %p212_p1 }
   0x6   : > { %216 = sbr.rel (%p213_p2) target bundleno = 782 (0x30e), region = 44 }
   0xd   : > { %p242_p3 = scmp.lt.s32.totalorder %s2439_s22, 1  ;;  %v3269_v0 = vld [vmem:[%s4562_s1 + $0x40] sm:$0xff]   ;;  %v3271_v2 = vld [vmem:[%s4562_s1 + $0x48] sm:$0xff]   ;;  %v3273_v4 = vld [vmem:[%s4562_s1 + $0x50] sm:$0xff]   ;;  %vm490_vm0 = vcmask 1045504   ;;  %vm409_vm1 = vcmask 1046528  }
   0xe   : > { %v3270_v1 = vld [vmem:[%s4562_s1] sm:$0xff]   ;;  %2539 = vmatprep.subr.bf16.mxu0 %v3269_v0  ;;  %v3272_v3 = vld [vmem:[%s4562_s1 + $0x8] sm:$0xff]   ;;  %v3274_v14 = vld [vmem:[%s4562_s1 + $0x10] sm:$0xff]   ;;  %s3303_s15 = smov 64   ;;  %s3304_s18 = smov 32   ;;  %vm1237_vm2 = vcmask 261120  }
   0xf   : > { %s4646_s22 = smov (!%p242_p3, %s2439_s22), 1  ;;  %2540 = vmatpush3.bf16.msra.mxu0 %v3270_v1  ;;  %v3275_v44 = vld [vmem:[%s4562_s1 + $0x58] sm:$0xff]   ;;  %s3305_s19 = smov 96   ;;  %v3277_v58 = vld [vmem:[%s4562_s1 + $0x60] sm:$0xff]   ;;  %vm1270_vm3 = vcmask 523264   ;;  %vm1303_vm4 = vcmask 785408  }
  0x10   : > { %s2777_s29 = smul.u32 216, %s4646_s22  ;;  %2541 = vmatprep.subr.bf16.mxu0 %v3271_v2  ;;  %v3276_v50 = vld [vmem:[%s4562_s1 + $0x18] sm:$0xff]   ;;  %v3278_v62 = vld [vmem:[%s4562_s1 + $0x20] sm:$0xff]   ;;  %s2494_s24 = sshll.u32 %s4646_s22, 8 }
  0x12   : > { %s3370_s12 = scalar_lea.vmem %s4561_s0, %s2777_s29 }
  0x13   : > { %v2531_v5 = vld [vmem:[%s3370_s12 + $0x18] sm:$0xff]   ;;  %v256_v6 = vld [vmem:[%s3370_s12 + $0xc] sm:$0xff]   ;;  %v258_v7 = vld [vmem:[%s3370_s12 + $0x14] sm:$0x1]  ;;  %2542 = vmatpush3.bf16.msra.mxu0 %v3272_v3 }
  0x14   : > { %v3375_v8 = vunpack.c.l.bf16 %v2531_v5  ;;  %v3377_v9 = vunpack.c.h.bf16 %v2531_v5  ;;  %v3379_v10 = vunpack.c.l.bf16 %v256_v6  ;;  %v3381_v11 = vunpack.c.h.bf16 %v256_v6  ;;  %v2496_v12 = vld [vmem:[%s3370_s12] sm:$0xff]   ;;  %v255_v13 = vld [vmem:[%s3370_s12 + $0x8] sm:$0x1]  ;;  %2543 = vmatprep.subr.bf16.mxu0 %v3273_v4  ;;  %v264_v49 = vld [vmem:[%s3370_s12 + $0x2c] sm:$0x1] }
  0x15   : > { %v312_v15 = vunpack.c.l.bf16 %v258_v7  ;;  %v3388_v16 = vunpack.c.l.bf16 %v2496_v12  ;;  %v3390_v17 = vunpack.c.h.bf16 %v2496_v12  ;;  %v309_v18 = vunpack.c.l.bf16 %v255_v13  ;;  %v261_v23 = vld [vmem:[%s3370_s12 + $0x20] sm:$0x1]  ;;  %v262_v43 = vld [vmem:[%s3370_s12 + $0x24] sm:$0xff]   ;;  %v3281_v7 = vld [vmem:[%s4562_s1 + $0x70] sm:$0xff]  }
  0x16   : > { %v3394_v19 = vpack.i.bf16 %v3377_v9, %v3375_v8  ;;  %v496_v20 = vrot.slane %v3379_v10, 2  ;;  %v497_v21 = vrot.slane %v3381_v11, 2  ;;  %v2794_v22 = vpack.i.bf16 %v3381_v11, %v3379_v10  ;;  %v3279_v3 = vld [vmem:[%s4562_s1 + $0x68] sm:$0xff]  }
  0x17   : > { %v499_v24 = vrot.slane %v312_v15, 2  ;;  %v410_v25 = vrot.slane %v3388_v16, 1  ;;  %v411_v26 = vrot.slane %v3390_v17, 1  ;;  %v413_v27 = vrot.slane %v309_v18, 1  ;;  %2544 = vmatpush3.bf16.msra.mxu0 %v3274_v14  ;;  %v3280_v4 = vld [vmem:[%s4562_s1 + $0x28] sm:$0xff]   ;;  %v3282_v14 = vld [vmem:[%s4562_s1 + $0x30] sm:$0xff]  }
  0x18   : > { %2790 = vrot.lane.b32.xlu1 %v3394_v19, %s3303_s15  ;;  %v498_v28 = vsel %vm490_vm0, %v496_v20, %v497_v21  ;;  %v491_v29 = vrot.slane %v3388_v16, 2  ;;  %v492_v30 = vrot.slane %v3390_v17, 2  ;;  %v494_v31 = vrot.slane %v309_v18, 2  ;;  %2545 = vmatprep.subr.bf16.mxu0 %v3275_v44  ;;  %v2532_v18 = vld [vmem:[%s3370_s12 + $0x30] sm:$0xff]  }
  0x19   : > { %v500_v32 = vsel %vm490_vm0, %v497_v21, %v499_v24  ;;  %v412_v33 = vsel %vm409_vm1, %v410_v25, %v411_v26  ;;  %v414_v34 = vsel %vm409_vm1, %v411_v26, %v413_v27  ;;  %v315_v35 = vunpack.c.l.bf16 %v261_v23  ;;  %v267_v23 = vld [vmem:[%s3370_s12 + $0x38] sm:$0x1] }
  0x1a   : > { %v2799_v36 = vpack.i.bf16 %v500_v32, %v498_v28  ;;  %v2804_v37 = vpack.i.bf16 %v414_v34, %v412_v33  ;;  %v493_v38 = vsel %vm490_vm0, %v491_v29, %v492_v30  ;;  %v495_v39 = vsel %vm490_vm0, %v492_v30, %v494_v31  ;;  %v3284_v27 = vld [vmem:[%s4562_s1 + $0x78] sm:$0xff]   ;;  %v3286_v29 = vld [vmem:[%s4562_s1 + $0x88] sm:$0xff]  }
  0x1b   : > { %v420_v40 = vrot.slane %v3375_v8, 1  ;;  %v421_v41 = vrot.slane %v3377_v9, 1  ;;  %v423_v42 = vrot.slane %v315_v35, 1  ;;  %v2809_v45 = vpack.i.bf16 %v495_v39, %v493_v38  ;;  %2546 = vmatpush3.bf16.msra.mxu0 %v3276_v50  ;;  %v3285_v28 = vld [vmem:[%s4562_s1 + $0x38] sm:$0xff]  }
  0x1c   : > { %2800 = vrot.lane.b32.xlu0 %v2799_v36, %s3304_s18  ;;  %2795 = vrot.lane.b32.xlu1 %v2794_v22, %s3305_s19  ;;  %v415_v46 = vrot.slane %v3379_v10, 1  ;;  %v416_v47 = vrot.slane %v3381_v11, 1  ;;  %v418_v48 = vrot.slane %v312_v15, 1  ;;  %v501_v53 = vrot.slane %v3375_v8, 2  ;;  %v3283_v15 = vld [vmem:[%s4562_s1 + $0x80] sm:$0xff]  }
  0x1d   : > { %v3428_v51 = vsel %vm409_vm1, %v420_v40, %v421_v41  ;;  %v3431_v52 = vsel %vm409_vm1, %v421_v41, %v423_v42  ;;  %v502_v54 = vrot.slane %v3377_v9, 2  ;;  %v504_v57 = vrot.slane %v315_v35, 2  ;;  %2547 = vmatprep.subr.bf16.mxu0 %v3277_v58  ;;  %2693 = vmatprep.subr.bf16.mxu1 %v3283_v15 }
  0x1e   : > { %v3436_v55 = vsel %vm409_vm1, %v415_v46, %v416_v47  ;;  %v3439_v56 = vsel %vm409_vm1, %v416_v47, %v418_v48  ;;  %v2814_v59 = vpack.i.bf16 %v3431_v52, %v3428_v51  ;;  %v3450_v61 = vunpack.c.l.bf16 %v262_v43  ;;  %2694 = vmatpush3.bf16.msra.mxu1 %v3283_v15  ;;  %v270_v46 = vld [vmem:[%s3370_s12 + $0x44] sm:$0x1] }
  0x1f   : > { %v2829_v60 = vpack.i.bf16 %v3439_v56, %v3436_v55  ;;  %v3456_v63 = vsel %vm490_vm0, %v501_v53, %v502_v54  ;;  %v3459_v0 = vsel %vm490_vm0, %v502_v54, %v504_v57  ;;  %v3461_v1 = vunpack.c.h.bf16 %v262_v43  ;;  %2548 = vmatpush3.bf16.msra.mxu0 %v3278_v62  ;;  %2695 = vmatprep.subr.bf16.mxu1 %v3286_v29 }
  0x20   : > { %2805 = vrot.lane.b32.xlu0 %v2804_v37, %s3304_s18  ;;  %2810 = vrot.lane.b32.xlu1 %v2809_v45, %s3303_s15  ;;  %v318_v2 = vunpack.c.l.bf16 %v264_v49  ;;  %v2819_v5 = vpack.i.bf16 %v3459_v0, %v3456_v63  ;;  %v425_v6 = vrot.slane %v3450_v61, 1  ;;  %v506_v21 = vrot.slane %v3450_v61, 2  ;;  %v268_v45 = vld [vmem:[%s3370_s12 + $0x3c] sm:$0xff]  }
  0x21   : > { %v426_v12 = vrot.slane %v3461_v1, 1  ;;  %2549 = vmatprep.subr.bf16.mxu0 %v3279_v3  ;;  %v2824_v20 = vpack.i.bf16 %v3461_v1, %v3450_v61  ;;  %v507_v22 = vrot.slane %v3461_v1, 2  ;;  %v3512_v31 = vunpack.c.l.bf16 %v2532_v18 }
  0x22   : > { %v428_v13 = vrot.slane %v318_v2, 1  ;;  %v509_v26 = vrot.slane %v318_v2, 2  ;;  %v3520_v34 = vunpack.c.h.bf16 %v2532_v18  ;;  %v321_v35 = vunpack.c.l.bf16 %v267_v23  ;;  %2696 = vmatpush3.bf16.msra.mxu1 %v3286_v29 }
  0x23   : > { %2550 = vmatpush3.bf16.msra.mxu0 %v3280_v4  ;;  %v3493_v24 = vsel %vm409_vm1, %v425_v6, %v426_v12  ;;  %v3515_v32 = vsel %vm490_vm0, %v506_v21, %v507_v22  ;;  %v511_v40 = vrot.slane %v3512_v31, 2  ;;  %v3546_v48 = vunpack.c.l.bf16 %v268_v45 }
  0x24   : > { %2815 = vrot.lane.b32.xlu0 %v2814_v59, %s3305_s19  ;;  %2830 = vrot.lane.b32.xlu1 %v2829_v60, %s3304_s18  ;;  %v3496_v25 = vsel %vm409_vm1, %v426_v12, %v428_v13  ;;  %v3518_v33 = vsel %vm490_vm0, %v507_v22, %v509_v26  ;;  %v431_v37 = vrot.slane %v3520_v34, 1  ;;  %v433_v38 = vrot.slane %v321_v35, 1  ;;  %v273_v12 = vld [vmem:[%s3370_s12 + $0x50] sm:$0x1] }
  0x25   : > { %2551 = vmatprep.subr.bf16.mxu0 %v3281_v7  ;;  %v2839_v30 = vpack.i.bf16 %v3496_v25, %v3493_v24  ;;  %v2859_v39 = vpack.i.bf16 %v3520_v34, %v3512_v31  ;;  %v512_v43 = vrot.slane %v3520_v34, 2  ;;  %v514_v44 = vrot.slane %v321_v35, 2  ;;  %v2533_v7 = vld [vmem:[%s3370_s12 + $0x48] sm:$0xff]  }
  0x26   : > { %v3537_v42 = vsel %vm409_vm1, %v431_v37, %v433_v38  ;;  %v3554_v53 = vunpack.c.h.bf16 %v268_v45  ;;  %v324_v54 = vunpack.c.l.bf16 %v270_v46  ;;  %v435_v58 = vrot.slane %v3546_v48, 1 }
  0x27   : > { %2552 = vmatpush3.bf16.msra.mxu0 %v3282_v14  ;;  %v3549_v49 = vsel %vm490_vm0, %v511_v40, %v512_v43  ;;  %v3552_v50 = vsel %vm490_vm0, %v512_v43, %v514_v44  ;;  %v516_v2 = vrot.slane %v3546_v48, 2  ;;  %v3580_v14 = vunpack.c.l.bf16 %v2533_v7  ;;  %v276_v40 = vld [vmem:[%s3370_s12 + $0x5c] sm:$0x1] }
  0x28   : > { %2820 = vrot.lane.b32.xlu0 %v2819_v5, %s3304_s18  ;;  %2835 = vrot.lane.b32.xlu1 %v2799_v36, %s3303_s15  ;;  %v430_v36 = vrot.slane %v3512_v31, 1  ;;  %v2879_v57 = vpack.i.bf16 %v3552_v50, %v3549_v49  ;;  %v438_v60 = vrot.slane %v324_v54, 1  ;;  %v2889_v62 = vpack.i.bf16 %v3554_v53, %v3546_v48 }
  0x29   : > { %2553 = vmatprep.subr.bf16.mxu0 %v3284_v27  ;;  %v519_v6 = vrot.slane %v324_v54, 2  ;;  %v3582_v15 = vunpack.c.h.bf16 %v2533_v7  ;;  %v327_v21 = vunpack.c.l.bf16 %v273_v12  ;;  %v440_v23 = vrot.slane %v3580_v14, 1 }
  0x2a   : > { %v3534_v41 = vsel %vm409_vm1, %v430_v36, %v431_v37  ;;  %v274_v37 = vld [vmem:[%s3370_s12 + $0x54] sm:$0xff]   ;;  %v1434_v38 = vpack.c.bf16 %v3459_v0, %v3456_v63 }
  0x2b   : > { %2554 = vmatpush3.bf16.msra.mxu0 %v3285_v28  ;;  %v2869_v47 = vpack.i.bf16 %v3537_v42, %v3534_v41  ;;  %v441_v26 = vrot.slane %v3582_v15, 1  ;;  %v443_v27 = vrot.slane %v327_v21, 1  ;;  %v2919_v28 = vpack.i.bf16 %v3582_v15, %v3580_v14 }
  0x2c   : > { %2825 = vrot.lane.b32.xlu0 %v2824_v20, %s3303_s15  ;;  %2845 = vrot.lane.b32.xlu1 %v3394_v19, %s3305_s19  ;;  %v2849_v19 = vpack.i.bf16 %v3518_v33, %v3515_v32  ;;  %v522_v35 = vrot.slane %v3582_v15, 2  ;;  %v524_v36 = vrot.slane %v327_v21, 2  ;;  %v3613_v44 = vunpack.c.l.bf16 %v274_v37 }
  0x2d   : > { %v3595_v29 = vsel %vm409_vm1, %v440_v23, %v441_v26  ;;  %2697 = vmatprep.mubr.msk.bf16.mxu1 %vm1237_vm2, %v1434_v38  ;;  %v3617_v0 = vunpack.c.h.bf16 %v274_v37  ;;  %v280_v23 = vld [vmem:[%s3370_s12 + $0x6c] sm:$0xff]  }
  0x2e   : > { %4594 = vst [vmem:[#allocation2_spill] sm:$0xff] %v3613_v44  ;;  %v525_v63 = vsel %vm490_vm0, %v522_v35, %v524_v36  ;;  %v445_v46 = vrot.slane %v3613_v44, 1 }
  0x2f   : > { %4595 = vst [vmem:[#allocation3_spill] sm:$0xff] %v3617_v0 }
  0x30   : > { %2840 = vrot.lane.b32.xlu0 %v2839_v30, %s3305_s19  ;;  %2855 = vrot.lane.b32.xlu1 %v2814_v59, %s3304_s18  ;;  %v436_v59 = vrot.slane %v3554_v53, 1 }
  0x32   : > { %v3568_v3 = vsel %vm409_vm1, %v435_v58, %v436_v59  ;;  %v3571_v4 = vsel %vm409_vm1, %v436_v59, %v438_v60  ;;  %v2949_v59 = vpack.i.bf16 %v3617_v0, %v3613_v44  ;;  %v526_v60 = vrot.slane %v3613_v44, 2 }
  0x33   : > { %v2899_v13 = vpack.i.bf16 %v3571_v4, %v3568_v3 }
  0x34   : > { %2850 = vrot.lane.b32.xlu0 %v2849_v19, %s3304_s18  ;;  %2865 = vrot.lane.b32.xlu1 %v2819_v5, %s3303_s15  ;;  %v517_v5 = vrot.slane %v3554_v53, 2 }
  0x36   : > { %v518_v18 = vsel %vm490_vm0, %v516_v2, %v517_v5 }
  0x38   : > { %2860 = vrot.lane.b32.xlu0 %v2859_v39, %s3303_s15  ;;  %2875 = vrot.lane.b32.xlu1 %v2824_v20, %s3305_s19  ;;  %v520_v20 = vsel %vm490_vm0, %v517_v5, %v519_v6  ;;  %v2534_v5 = vld [vmem:[%s3370_s12 + $0x60] sm:$0xff]  }
  0x39   : > { %v2909_v22 = vpack.i.bf16 %v520_v20, %v518_v18  ;;  %v1443_v58 = vpack.c.bf16 %v520_v20, %v518_v18  ;;  %v3642_v7 = vunpack.c.l.bf16 %v2534_v5  ;;  %v3644_v12 = vunpack.c.h.bf16 %v2534_v5 }
  0x3b   : > { %4598 = vst [vmem:[#allocation6_spill] sm:$0xff] %v3642_v7  ;;  %4599 = vst [vmem:[#allocation7_spill] sm:$0xff] %v3644_v12  ;;  %v532_v36 = vrot.slane %v3644_v12, 2 }
  0x3c   : > { %2870 = vrot.lane.b32.xlu0 %v2869_v47, %s3305_s19  ;;  %2885 = vrot.lane.b32.xlu1 %v2839_v30, %s3304_s18  ;;  %v521_v30 = vrot.slane %v3580_v14, 2 }
  0x3e   : > { %v523_v45 = vsel %vm490_vm0, %v521_v30, %v522_v35  ;;  %v451_v30 = vrot.slane %v3644_v12, 1  ;;  %v531_v35 = vrot.slane %v3642_v7, 2 }
  0x3f   : > { %v1446_v38 = vpack.c.bf16 %v525_v63, %v523_v45 }
  0x40   : > { %2880 = vrot.lane.b32.xlu0 %v2879_v57, %s3304_s18  ;;  %2895 = vrot.lane.b32.xlu1 %v2849_v19, %s3303_s15  ;;  %v3600_v19 = vsel %vm409_vm1, %v441_v26, %v443_v27  ;;  %v282_v26 = vld [vmem:[%s3370_s12 + $0x74] sm:$0x1]  ;;  %v450_v27 = vrot.slane %v3642_v7, 1 }
  0x41   : > { %v2929_v43 = vpack.i.bf16 %v3600_v19, %v3595_v29 }
  0x44   : > { %2890 = vrot.lane.b32.xlu0 %v2889_v62, %s3303_s15  ;;  %2905 = vrot.lane.b32.xlu1 %v2859_v39, %s3305_s19  ;;  %v1437_v39 = vpack.c.bf16 %v3518_v33, %v3515_v32  ;;  %v330_v32 = vunpack.c.l.bf16 %v276_v40  ;;  %v2939_v33 = vpack.i.bf16 %v525_v63, %v523_v45  ;;  %v3660_v40 = vunpack.c.l.bf16 %v280_v23 }
  0x45   : > { %v3672_v63 = vsel %vm409_vm1, %v450_v27, %v451_v30  ;;  %v2535_v27 = vld [vmem:[%s3370_s12 + $0x78] sm:$0xff]  }
  0x46   : > { %2698 = vmatmul.mubr.msk.bf16.vlgmr.msra.gmra.mrb[0].mxu1 %vm1237_vm2, %v1437_v39  ;;  %v448_v54 = vrot.slane %v330_v32, 1  ;;  %v529_v2 = vrot.slane %v330_v32, 2  ;;  %4600 = vst [vmem:[#allocation8_spill] sm:$0xff] %v3660_v40  ;;  %v3662_v32 = vunpack.c.h.bf16 %v280_v23  ;;  %4602 = vst [vmem:[#allocation10_spill] sm:$0xff] %v3672_v63 }
  0x48   : > { %2900 = vrot.lane.b32.xlu0 %v2899_v13, %s3305_s19  ;;  %2915 = vrot.lane.b32.xlu1 %v2869_v47, %s3304_s18  ;;  %v446_v47 = vrot.slane %v3617_v0, 1  ;;  %4601 = vst [vmem:[#allocation9_spill] sm:$0xff] %v3662_v32  ;;  %v3009_v23 = vpack.i.bf16 %v3662_v32, %v3660_v40 }
  0x4a   : > { %v3634_v6 = vsel %vm409_vm1, %v445_v46, %v446_v47  ;;  %v336_v46 = vunpack.c.l.bf16 %v282_v26 }
  0x4b   : > { %4596 = vst [vmem:[#allocation4_spill] sm:$0xff] %v3634_v6 }
  0x4c   : > { %2910 = vrot.lane.b32.xlu0 %v2909_v22, %s3304_s18  ;;  %2925 = vrot.lane.b32.xlu1 %v2879_v57, %s3303_s15  ;;  %v1440_v57 = vpack.c.bf16 %v3552_v50, %v3549_v49  ;;  %v3637_v49 = vsel %vm409_vm1, %v446_v47, %v448_v54  ;;  %v279_v50 = vld [vmem:[%s3370_s12 + $0x68] sm:$0x1]  ;;  %v536_v47 = vrot.slane %v3660_v40, 2  ;;  %v537_v54 = vrot.slane %v3662_v32, 2 }
  0x4d   : > { %4597 = vst [vmem:[#allocation5_spill] sm:$0xff] %v3637_v49  ;;  %v333_v21 = vunpack.c.l.bf16 %v279_v50  ;;  %v539_v45 = vrot.slane %v336_v46, 2 }
  0x4e   : > { %2701 = vmatprep.mubr.msk.bf16.mxu1 %vm1237_vm2, %v1440_v57 }
  0x4f   : > { %2702 = vmatmul.mubr.msk.bf16.gmra.mrb[4].mxu1 %vm1237_vm2, %v1443_v58  ;;  %v534_v37 = vrot.slane %v333_v21, 2  ;;  %v533_v58 = vsel %vm490_vm0, %v531_v35, %v532_v36  ;;  %v540_v5 = vsel %vm490_vm0, %v537_v54, %v539_v45  ;;  %v3708_v35 = vunpack.c.l.bf16 %v2535_v27 }
  0x50   : > { %2920 = vrot.lane.b32.xlu0 %v2919_v28, %s3303_s15  ;;  %2935 = vrot.lane.b32.xlu1 %v2889_v62, %s3305_s19  ;;  %v527_v62 = vrot.slane %v3617_v0, 2 }
  0x51   : > { %2705 = vmatprep.mubr.msk.bf16.mxu1 %vm1237_vm2, %v1446_v38  ;;  %4606 = vst [vmem:[#allocation14_spill] sm:$0xff] %v3708_v35  ;;  %v288_v38 = vld [vmem:[%s3370_s12 + $0x8c] sm:$0x1] }
  0x52   : > { %v528_v18 = vsel %vm490_vm0, %v526_v60, %v527_v62  ;;  %v530_v20 = vsel %vm490_vm0, %v527_v62, %v529_v2  ;;  %v535_v60 = vsel %vm490_vm0, %v532_v36, %v534_v37  ;;  %v538_v2 = vsel %vm490_vm0, %v536_v47, %v537_v54  ;;  %v286_v37 = vld [vmem:[%s3370_s12 + $0x84] sm:$0xff]  }
  0x53   : > { %v1449_v39 = vpack.c.bf16 %v530_v20, %v528_v18  ;;  %v1455_v50 = vpack.c.bf16 %v540_v5, %v538_v2  ;;  %v3718_v54 = vunpack.c.l.bf16 %v286_v37  ;;  %v3720_v45 = vunpack.c.h.bf16 %v286_v37 }
  0x54   : > { %2930 = vrot.lane.b32.xlu0 %v2929_v43, %s3305_s19  ;;  %2945 = vrot.lane.b32.xlu1 %v2899_v13, %s3304_s18  ;;  %v2959_v13 = vpack.i.bf16 %v3637_v49, %v3634_v6 }
  0x55   : > { %4608 = vst [vmem:[#allocation16_spill] sm:$0xff] %v3718_v54  ;;  %4609 = vst [vmem:[#allocation17_spill] sm:$0xff] %v3720_v45 }
  0x57   : > { %2706 = vmatmul.mubr.msk.bf16.gmra.mrb[8].mxu1 %vm1237_vm2, %v1449_v39  ;;  %v3029_v39 = vpack.i.bf16 %v540_v5, %v538_v2  ;;  %v546_v2 = vrot.slane %v3718_v54, 2  ;;  %v547_v5 = vrot.slane %v3720_v45, 2 }
  0x58   : > { %2940 = vrot.lane.b32.xlu0 %v2939_v33, %s3304_s18  ;;  %2955 = vrot.lane.b32.xlu1 %v2909_v22, %s3303_s15  ;;  %v2969_v22 = vpack.i.bf16 %v530_v20, %v528_v18  ;;  %v2999_v18 = vpack.i.bf16 %v535_v60, %v533_v58  ;;  %v455_v20 = vrot.slane %v3660_v40, 1 }
  0x59   : > { %v548_v37 = vsel %vm490_vm0, %v546_v2, %v547_v5 }
  0x5c   : > { %2950 = vrot.lane.b32.xlu0 %v2949_v59, %s3303_s15  ;;  %2965 = vrot.lane.b32.xlu1 %v2919_v28, %s3305_s19  ;;  %v453_v28 = vrot.slane %v333_v21, 1  ;;  %v458_v21 = vrot.slane %v336_v46, 1  ;;  %v541_v46 = vrot.slane %v3708_v35, 2 }
  0x5e   : > { %v3675_v57 = vsel %vm409_vm1, %v451_v30, %v453_v28  ;;  %v285_v30 = vld [vmem:[%s3370_s12 + $0x80] sm:$0x1] }
  0x5f   : > { %4603 = vst [vmem:[#allocation11_spill] sm:$0xff] %v3675_v57  ;;  %v2989_v62 = vpack.i.bf16 %v3675_v57, %v3672_v63  ;;  %v339_v36 = vunpack.c.l.bf16 %v285_v30 }
  0x60   : > { %2960 = vrot.lane.b32.xlu0 %v2959_v13, %s3305_s19  ;;  %2975 = vrot.lane.b32.xlu1 %v2929_v43, %s3304_s18  ;;  %v2979_v43 = vpack.i.bf16 %v3644_v12, %v3642_v7 }
  0x64   : > { %2970 = vrot.lane.b32.xlu0 %v2969_v22, %s3304_s18  ;;  %2985 = vrot.lane.b32.xlu1 %v2939_v33, %s3303_s15  ;;  %v1452_v33 = vpack.c.bf16 %v535_v60, %v533_v58  ;;  %v342_v58 = vunpack.c.l.bf16 %v288_v38  ;;  %v460_v60 = vrot.slane %v3708_v35, 1 }
  0x66   : > { %2709 = vmatprep.mubr.msk.bf16.mxu1 %vm1237_vm2, %v1452_v33  ;;  %v468_v2 = vrot.slane %v342_v58, 1 }
  0x67   : > { %2710 = vmatmul.mubr.msk.bf16.gmra.mrb[12].mxu1 %vm1237_vm2, %v1455_v50  ;;  %v463_v50 = vrot.slane %v339_v36, 1 }
  0x68   : > { %2980 = vrot.lane.b32.xlu0 %v2979_v43, %s3303_s15  ;;  %2995 = vrot.lane.b32.xlu1 %v2949_v59, %s3305_s19  ;;  %v456_v59 = vrot.slane %v3662_v32, 1 }
  0x6a   : > { %v3697_v26 = vsel %vm409_vm1, %v455_v20, %v456_v59  ;;  %v549_v20 = vrot.slane %v342_v58, 2 }
  0x6b   : > { %4604 = vst [vmem:[#allocation12_spill] sm:$0xff] %v3697_v26 }
  0x6c   : > { %2990 = vrot.lane.b32.xlu0 %v2989_v62, %s3305_s19  ;;  %3005 = vrot.lane.b32.xlu1 %v2959_v13, %s3304_s18  ;;  %v3700_v13 = vsel %vm409_vm1, %v456_v59, %v458_v21  ;;  %v550_v38 = vsel %vm490_vm0, %v547_v5, %v549_v20 }
  0x6d   : > { %4605 = vst [vmem:[#allocation13_spill] sm:$0xff] %v3700_v13  ;;  %v3019_v28 = vpack.i.bf16 %v3700_v13, %v3697_v26 }
  0x70   : > { %3000 = vrot.lane.b32.xlu0 %v2999_v18, %s3304_s18  ;;  %3015 = vrot.lane.b32.xlu1 %v2969_v22, %s3303_s15  ;;  %v3710_v22 = vunpack.c.h.bf16 %v2535_v27 }
  0x72   : > { %4607 = vst [vmem:[#allocation15_spill] sm:$0xff] %v3710_v22  ;;  %v542_v47 = vrot.slane %v3710_v22, 2  ;;  %v461_v33 = vrot.slane %v3710_v22, 1 }
  0x74   : > { %3010 = vrot.lane.b32.xlu0 %v3009_v23, %s3303_s15  ;;  %3025 = vrot.lane.b32.xlu1 %v2979_v43, %s3305_s19  ;;  %v544_v43 = vrot.slane %v339_v36, 2  ;;  %v543_v59 = vsel %vm490_vm0, %v541_v46, %v542_v47  ;;  %v3733_v27 = vsel %vm409_vm1, %v460_v60, %v461_v33  ;;  %v3736_v30 = vsel %vm409_vm1, %v461_v33, %v463_v50 }
  0x75   : > { %4610 = vst [vmem:[#allocation18_spill] sm:$0xff] %v3733_v27  ;;  %4611 = vst [vmem:[#allocation19_spill] sm:$0xff] %v3736_v30  ;;  %v3049_v46 = vpack.i.bf16 %v3736_v30, %v3733_v27  ;;  %v465_v33 = vrot.slane %v3718_v54, 1  ;;  %v466_v50 = vrot.slane %v3720_v45, 1 }
  0x76   : > { %v545_v21 = vsel %vm490_vm0, %v542_v47, %v544_v43  ;;  %v2536_v47 = vld [vmem:[%s3370_s12 + $0x90] sm:$0xff]   ;;  %v291_v43 = vld [vmem:[%s3370_s12 + $0x98] sm:$0x1] }
  0x77   : > { %v1458_v36 = vpack.c.bf16 %v545_v21, %v543_v59  ;;  %v3059_v60 = vpack.i.bf16 %v545_v21, %v543_v59  ;;  %v3754_v5 = vunpack.c.h.bf16 %v2536_v47  ;;  %v345_v20 = vunpack.c.l.bf16 %v291_v43 }
  0x78   : > { %3020 = vrot.lane.b32.xlu0 %v3019_v28, %s3305_s19  ;;  %3035 = vrot.lane.b32.xlu1 %v2989_v62, %s3304_s18  ;;  %v3039_v62 = vpack.i.bf16 %v3710_v22, %v3708_v35  ;;  %v3763_v59 = vsel %vm409_vm1, %v465_v33, %v466_v50  ;;  %v3766_v21 = vsel %vm409_vm1, %v466_v50, %v468_v2  ;;  %v294_v35 = vld [vmem:[%s3370_s12 + $0xa4] sm:$0x1] }
  0x79   : > { %2713 = vmatprep.mubr.msk.bf16.mxu1 %vm1237_vm2, %v1458_v36  ;;  %4613 = vst [vmem:[#allocation21_spill] sm:$0xff] %v3754_v5  ;;  %4614 = vst [vmem:[#allocation22_spill] sm:$0xff] %v3763_v59  ;;  %v471_v36 = vrot.slane %v3754_v5, 1  ;;  %v552_v50 = vrot.slane %v3754_v5, 2  ;;  %v554_v2 = vrot.slane %v345_v20, 2  ;;  %v348_v22 = vunpack.c.l.bf16 %v294_v35 }
  0x7a   : > { %4615 = vst [vmem:[#allocation23_spill] sm:$0xff] %v3766_v21 }
  0x7b   : > { %v559_v13 = vrot.slane %v348_v22, 2 }
  0x7c   : > { %3030 = vrot.lane.b32.xlu0 %v3029_v39, %s3304_s18  ;;  %3045 = vrot.lane.b32.xlu1 %v2999_v18, %s3303_s15  ;;  %v1461_v18 = vpack.c.bf16 %v550_v38, %v548_v37 }
  0x7e   : > { %2714 = vmatmul.mubr.msk.bf16.gmra.mrb[16].mxu1 %vm1237_vm2, %v1461_v18  ;;  %v473_v18 = vrot.slane %v345_v20, 1  ;;  %v2537_v20 = vld [vmem:[%s3370_s12 + $0xa8] sm:$0xff]  }
  0x80   : > { %3040 = vrot.lane.b32.xlu0 %v3039_v62, %s3303_s15  ;;  %3055 = vrot.lane.b32.xlu1 %v3009_v23, %s3305_s19  ;;  %v3752_v23 = vunpack.c.l.bf16 %v2536_v47  ;;  %v292_v47 = vld [vmem:[%s3370_s12 + $0x9c] sm:$0xff]  }
  0x82   : > { %4612 = vst [vmem:[#allocation20_spill] sm:$0xff] %v3752_v23  ;;  %v470_v58 = vrot.slane %v3752_v23, 1  ;;  %v551_v33 = vrot.slane %v3752_v23, 2  ;;  %v3797_v40 = vpack.i.bf16 %v3754_v5, %v3752_v23  ;;  %v478_v23 = vrot.slane %v348_v22, 1 }
  0x84   : > { %3050 = vrot.lane.b32.xlu0 %v3049_v46, %s3305_s19  ;;  %3065 = vrot.lane.b32.xlu1 %v3019_v28, %s3304_s18  ;;  %v3760_v28 = vpack.i.bf16 %v3720_v45, %v3718_v54  ;;  %v3783_v54 = vunpack.c.l.bf16 %v292_v47  ;;  %v3786_v45 = vsel %vm409_vm1, %v470_v58, %v471_v36  ;;  %v553_v35 = vsel %vm490_vm0, %v551_v33, %v552_v50 }
  0x85   : > { %4616 = vst [vmem:[#allocation24_spill] sm:$0xff] %v3786_v45 }
  0x86   : > { %v556_v26 = vrot.slane %v3783_v54, 2 }
  0x88   : > { %3060 = vrot.lane.b32.xlu0 %v3059_v60, %s3304_s18  ;;  %3075 = vrot.lane.b32.xlu1 %v3029_v39, %s3303_s15  ;;  %v3776_v39 = vpack.i.bf16 %v3766_v21, %v3763_v59  ;;  %v3789_v59 = vsel %vm409_vm1, %v471_v36, %v473_v18  ;;  %v3791_v21 = vunpack.c.h.bf16 %v292_v47 }
  0x89   : > { %4617 = vst [vmem:[#allocation25_spill] sm:$0xff] %v3789_v59  ;;  %v3805_v58 = vpack.i.bf16 %v3789_v59, %v3786_v45  ;;  %v3813_v45 = vunpack.c.l.bf16 %v2537_v20 }
  0x8a   : > { %v3771_v43 = vpop.permute.xlu1 %2790  ;;  %v476_v47 = vrot.slane %v3791_v21, 1 }
  0x8c   : > { %3070 = vrot.lane.b32.xlu0 %v3760_v28, %s3303_s15  ;;  %3085 = vrot.lane.b32.xlu1 %v3039_v62, %s3305_s19  ;;  %v3793_v62 = vpack.i.bf16 %v550_v38, %v548_v37  ;;  %v555_v37 = vsel %vm490_vm0, %v552_v50, %v554_v2  ;;  %v475_v38 = vrot.slane %v3783_v54, 1  ;;  %v2793_v2 = vunpack.i.h.bf16 %v3771_v43 }
  0x8d   : > { %v1464_v6 = vpack.c.bf16 %v555_v37, %v553_v35 }
  0x8e   : > { %v2801_v27 = vpop.permute.xlu0 %2800  ;;  %v2796_v30 = vpop.permute.xlu1 %2795 }
  0x8f   : > { %v2803_v36 = vunpack.i.h.bf16 %v2801_v27  ;;  %v2802_v18 = vunpack.i.l.bf16 %v2801_v27  ;;  %v2792_v27 = vunpack.i.l.bf16 %v3771_v43  ;;  %v2798_v12 = vunpack.i.h.bf16 %v2796_v30  ;;  %2717 = vmatprep.mubr.msk.bf16.mxu1 %vm1237_vm2, %v1464_v6 }
  0x90   : > { %3080 = vrot.lane.b32.xlu0 %v3776_v39, %s3305_s19  ;;  %3095 = vrot.lane.b32.xlu1 %v3049_v46, %s3304_s18  ;;  %v557_v46 = vrot.slane %v3791_v21, 2  ;;  %v2797_v63 = vunpack.i.l.bf16 %v2796_v30  ;;  %v480_v6 = vrot.slane %v3813_v45, 1 }
  0x91   : > { %v1337_v43 = vsel %vm1237_vm2, %v3439_v56, %v2803_v36 }
  0x92   : > { %v2806_v5 = vpop.permute.xlu0 %2805  ;;  %v2811_v32 = vpop.permute.xlu1 %2810  ;;  %v1369_v56 = vsel %vm1270_vm3, %v1337_v43, %v2793_v2 }
  0x93   : > { %v2808_v59 = vunpack.i.h.bf16 %v2806_v5  ;;  %v2807_v33 = vunpack.i.l.bf16 %v2806_v5  ;;  %v2813_v7 = vunpack.i.h.bf16 %v2811_v32  ;;  %v2812_v50 = vunpack.i.l.bf16 %v2811_v32 }
  0x94   : > { %3090 = vrot.lane.b32.xlu0 %v3793_v62, %s3304_s18  ;;  %3105 = vrot.lane.b32.xlu1 %v3059_v60, %s3303_s15  ;;  %v1336_v32 = vsel %vm1237_vm2, %v3436_v55, %v2802_v18  ;;  %v558_v60 = vsel %vm490_vm0, %v556_v26, %v557_v46 }
  0x95   : > { %v1239_v22 = vsel %vm1237_vm2, %v3390_v17, %v2808_v59  ;;  %v1238_v5 = vsel %vm1237_vm2, %v3388_v16, %v2807_v33  ;;  %v560_v59 = vsel %vm490_vm0, %v557_v46, %v559_v13  ;;  %v3832_v16 = vunpack.c.h.bf16 %v2537_v20  ;;  %v297_v33 = vld [vmem:[%s3370_s12 + $0xb0] sm:$0x1] }
  0x96   : > { %v1271_v30 = vsel %vm1270_vm3, %v1238_v5, %v2812_v50  ;;  %v1272_v57 = vsel %vm1270_vm3, %v1239_v22, %v2813_v7  ;;  %v2816_v44 = vpop.permute.xlu0 %2815  ;;  %v2831_v0 = vpop.permute.xlu1 %2830  ;;  %v1368_v55 = vsel %vm1270_vm3, %v1336_v32, %v2792_v27  ;;  %v1467_v7 = vpack.c.bf16 %v560_v59, %v558_v60  ;;  %v3909_v32 = vld [vmem:[%s3370_s12 + $0xc8] sm:$0x1] }
  0x97   : > { %v2818_v49 = vunpack.i.h.bf16 %v2816_v44  ;;  %v2817_v17 = vunpack.i.l.bf16 %v2816_v44  ;;  %v1304_v13 = vsel %vm1303_vm4, %v1271_v30, %v2797_v63  ;;  %v1305_v20 = vsel %vm1303_vm4, %v1272_v57, %v2798_v12 }
  0x98   : > { %3100 = vrot.lane.b32.xlu0 %v3797_v40, %s3303_s15  ;;  %3115 = vrot.lane.b32.xlu1 %v3760_v28, %s3305_s19  ;;  %v3847_v28 = vsel %vm409_vm1, %v475_v38, %v476_v47  ;;  %v3850_v50 = vsel %vm409_vm1, %v476_v47, %v478_v23  ;;  %v351_v2 = vunpack.c.l.bf16 %v297_v33  ;;  %v3853_v27 = vpack.i.bf16 %v555_v37, %v553_v35  ;;  %v3882_v33 = vld [vmem:[%s3370_s12 + $0xbc] sm:$0x1] }
  0x99   : > { %v1400_v26 = vsel %vm1303_vm4, %v1368_v55, %v2817_v17  ;;  %v1401_v44 = vsel %vm1303_vm4, %v1369_v56, %v2818_v49  ;;  %2718 = vmatmul.mubr.msk.bf16.gmra.mrb[20].mxu1 %vm1237_vm2, %v1467_v7  ;;  %v3857_v49 = vpack.i.bf16 %v3791_v21, %v3783_v54  ;;  %v481_v12 = vrot.slane %v3832_v16, 1  ;;  %v298_v17 = vld [vmem:[%s3370_s12 + $0xb4] sm:$0xff]  }
  0x9a   : > { %v2821_v36 = vpop.permute.xlu0 %2820  ;;  %v2836_v18 = vpop.permute.xlu1 %2835  ;;  %v1433_v46 = vpack.c.bf16 %v1401_v44, %v1400_v26  ;;  %v1432_v63 = vpack.c.bf16 %v1305_v20, %v1304_v13  ;;  %v2833_v57 = vunpack.i.h.bf16 %v2831_v0  ;;  %v2832_v23 = vunpack.i.l.bf16 %v2831_v0 }
  0x9b   : > { %v3867_v35 = vpack.i.bf16 %v3850_v50, %v3847_v28  ;;  %v3869_v47 = vpack.i.bf16 %v560_v59, %v558_v60  ;;  %v3873_v22 = vpack.i.bf16 %v3832_v16, %v3813_v45  ;;  %v483_v5 = vrot.slane %v351_v2, 1 }
  0x9c   : > { %3110 = vrot.lane.b32.xlu0 %v3805_v58, %s3305_s19  ;;  %1704 = vmatprep.mubr.bf16.mxu0 %v1433_v46  ;;  %v2823_v0 = vunpack.i.h.bf16 %v2821_v36  ;;  %v2822_v43 = vunpack.i.l.bf16 %v2821_v36  ;;  %v562_v30 = vrot.slane %v3832_v16, 2  ;;  %v2838_v55 = vunpack.i.h.bf16 %v2836_v18 }
  0x9d   : > { %3125 = vrot.lane.b32.xlu1 %v3776_v39, %s3304_s18  ;;  %1705 = vmatmul.mubr.bf16.vlgmr.msra.gmra.mrb[0].mxu0 %v1432_v63  ;;  %v3877_v39 = vsel %vm409_vm1, %v480_v6, %v481_v12  ;;  %v2837_v60 = vunpack.i.l.bf16 %v2836_v18  ;;  %v1241_v7 = vsel %vm1237_vm2, %v3381_v11, %v2833_v57  ;;  %v1240_v26 = vsel %vm1237_vm2, %v3379_v10, %v2832_v23 }
  0x9e   : > { %v2826_v37 = vpop.permute.xlu0 %2825  ;;  %v2846_v38 = vpop.permute.xlu1 %2845  ;;  %v564_v18 = vrot.slane %v351_v2, 2  ;;  %v3892_v46 = vunpack.c.l.bf16 %v298_v17  ;;  %v3894_v6 = vunpack.c.h.bf16 %v298_v17  ;;  %v4593_v63 = vunpack.c.l.bf16 %v3882_v33  ;;  %v2538_v17 = vld [vmem:[%s3370_s12 + $0xc0] sm:$0xff]  }
  0x9f   : > { %v2828_v59 = vunpack.i.h.bf16 %v2826_v37  ;;  %v2827_v56 = vunpack.i.l.bf16 %v2826_v37  ;;  %v2848_v44 = vunpack.i.h.bf16 %v2846_v38  ;;  %v2847_v13 = vunpack.i.l.bf16 %v2846_v38 }
  0xa0   : > { %3120 = vrot.lane.b32.xlu0 %v3853_v27, %s3304_s18  ;;  %v1339_v11 = vsel %vm1237_vm2, %v3431_v52, %v2823_v0  ;;  %v1338_v10 = vsel %vm1237_vm2, %v3428_v51, %v2822_v43  ;;  %v1274_v37 = vsel %vm1270_vm3, %v1241_v7, %v2838_v55  ;;  %v566_v7 = vrot.slane %v3892_v46, 2 }
  0xa1   : > { %3135 = vrot.lane.b32.xlu1 %v3793_v62, %s3303_s15  ;;  %v1273_v62 = vsel %vm1270_vm3, %v1240_v26, %v2837_v60  ;;  %v1370_v2 = vsel %vm1270_vm3, %v1338_v10, %v2827_v56  ;;  %v1371_v38 = vsel %vm1270_vm3, %v1339_v11, %v2828_v59  ;;  %v1307_v43 = vsel %vm1303_vm4, %v1274_v37, %v2848_v44 }
  0xa2   : > { %v2841_v20 = vpop.permute.xlu0 %2840  ;;  %v2856_v36 = vpop.permute.xlu1 %2855  ;;  %v1306_v0 = vsel %vm1303_vm4, %v1273_v62, %v2847_v13  ;;  %v3918_v56 = vsel %vm409_vm1, %v481_v12, %v483_v5  ;;  %v567_v26 = vrot.slane %v3894_v6, 2  ;;  %v3926_v11 = vunpack.c.h.bf16 %v2538_v17 }
  0xa3   : > { %v2843_v57 = vunpack.i.h.bf16 %v2841_v20  ;;  %v2842_v23 = vunpack.i.l.bf16 %v2841_v20  ;;  %v3924_v20 = vunpack.c.l.bf16 %v2538_v17  ;;  %v4592_v13 = vunpack.c.l.bf16 %v3909_v32 }
  0xa4   : > { %3130 = vrot.lane.b32.xlu0 %v3857_v49, %s3303_s15  ;;  %v2858_v44 = vunpack.i.h.bf16 %v2856_v36  ;;  %v2857_v10 = vunpack.i.l.bf16 %v2856_v36  ;;  %v1435_v12 = vpack.c.bf16 %v1307_v43, %v1306_v0  ;;  %v3935_v5 = vpack.i.bf16 %v3918_v56, %v3877_v39 }
  0xa5   : > { %3145 = vrot.lane.b32.xlu1 %v3797_v40, %s3305_s19  ;;  %v1402_v51 = vsel %vm1303_vm4, %v1370_v2, %v2842_v23  ;;  %v1403_v52 = vsel %vm1303_vm4, %v1371_v38, %v2843_v57  ;;  %v569_v40 = vrot.slane %v4593_v63, 2  ;;  %v611_v57 = vrot.slane %v3924_v20, 2 }
  0xa6   : > { %v2851_v55 = vpop.permute.xlu0 %2850  ;;  %v2866_v60 = vpop.permute.xlu1 %2865  ;;  %v1436_v59 = vpack.c.bf16 %v1403_v52, %v1402_v51  ;;  %v612_v23 = vrot.slane %v3926_v11, 2  ;;  %v614_v62 = vrot.slane %v4592_v13, 2  ;;  %v4618_v17 = vrot.slane %v3813_v45, 2 }
  0xa7   : > { %v2853_v36 = vunpack.i.h.bf16 %v2851_v55  ;;  %v2852_v37 = vunpack.i.l.bf16 %v2851_v55  ;;  %v565_v51 = vsel %vm490_vm0, %v562_v30, %v564_v18  ;;  %v2868_v52 = vunpack.i.h.bf16 %v2866_v60 }
  0xa8   : > { %3140 = vrot.lane.b32.xlu0 %v3867_v35, %s3305_s19  ;;  %1712 = vmatprep.mubr.bf16.mxu0 %v1436_v59  ;;  %v2867_v0 = vunpack.i.l.bf16 %v2866_v60  ;;  %v3946_v43 = vsel %vm490_vm0, %v566_v7, %v567_v26  ;;  %v3949_v59 = vsel %vm490_vm0, %v567_v26, %v569_v40  ;;  %v1243_v55 = vsel %vm1237_vm2, %v3377_v9, %v2858_v44 }
  0xa9   : > { %3155 = vrot.lane.b32.xlu1 %v3805_v58, %s3304_s18  ;;  %1713 = vmatmul.mubr.bf16.gmra.mrb[4].mxu0 %v1435_v12  ;;  %v563_v58 = vsel %vm490_vm0, %v4618_v17, %v562_v30  ;;  %v1242_v12 = vsel %vm1237_vm2, %v3375_v8, %v2857_v10  ;;  %v3960_v60 = vsel %vm490_vm0, %v611_v57, %v612_v23 }
  0xaa   : > { %v2861_v2 = vpop.permute.xlu0 %2860  ;;  %v2876_v38 = vpop.permute.xlu1 %2875  ;;  %v3963_v7 = vsel %vm490_vm0, %v612_v23, %v614_v62  ;;  %v1341_v9 = vsel %vm1237_vm2, %v3496_v25, %v2853_v36  ;;  %v1340_v8 = vsel %vm1237_vm2, %v3493_v24, %v2852_v37  ;;  %v1470_v10 = vpack.c.bf16 %v565_v51, %v563_v58 }
  0xab   : > { %v2863_v13 = vunpack.i.h.bf16 %v2861_v2  ;;  %v2862_v63 = vunpack.i.l.bf16 %v2861_v2  ;;  %v2878_v30 = vunpack.i.h.bf16 %v2876_v38  ;;  %v2877_v18 = vunpack.i.l.bf16 %v2876_v38 }
  0xac   : > { %3150 = vrot.lane.b32.xlu0 %v3869_v47, %s3304_s18  ;;  %v1476_v44 = vpack.c.bf16 %v3963_v7, %v3960_v60  ;;  %v1276_v57 = vsel %vm1270_vm3, %v1243_v55, %v2868_v52  ;;  %2721 = vmatprep.mubr.msk.bf16.mxu1 %vm1237_vm2, %v1470_v10  ;;  %v1473_v24 = vpack.c.bf16 %v3949_v59, %v3946_v43  ;;  %v486_v55 = vrot.slane %v3894_v6, 1 }
  0xad   : > { %3165 = vrot.lane.b32.xlu1 %v3853_v27, %s3303_s15  ;;  %v1275_v27 = vsel %vm1270_vm3, %v1242_v12, %v2867_v0  ;;  %v1372_v23 = vsel %vm1270_vm3, %v1340_v8, %v2862_v63  ;;  %v1373_v62 = vsel %vm1270_vm3, %v1341_v9, %v2863_v13  ;;  %v1309_v63 = vsel %vm1303_vm4, %v1276_v57, %v2878_v30 }
  0xae   : > { %v2871_v26 = vpop.permute.xlu0 %2870  ;;  %v2886_v40 = vpop.permute.xlu1 %2885  ;;  %v1308_v37 = vsel %vm1303_vm4, %v1275_v27, %v2877_v18  ;;  %2722 = vmatmul.mubr.msk.bf16.gmra.mrb[24].mxu1 %vm1237_vm2, %v1473_v24  ;;  %v485_v0 = vrot.slane %v3892_v46, 1  ;;  %v4619_v12 = vunpack.c.l.bf16 %v3882_v33  ;;  %v3994_v30 = vpack.i.bf16 %v565_v51, %v563_v58 }
  0xaf   : > { %v2873_v2 = vunpack.i.h.bf16 %v2871_v26  ;;  %v2872_v38 = vunpack.i.l.bf16 %v2871_v26  ;;  %2725 = vmatprep.mubr.msk.bf16.mxu1 %vm1237_vm2, %v1476_v44  ;;  %v1438_v18 = vpack.c.bf16 %v1309_v63, %v1308_v37  ;;  %v2888_v9 = vunpack.i.h.bf16 %v2886_v40 }
  0xb0   : > { %3160 = vrot.lane.b32.xlu0 %v3873_v22, %s3303_s15  ;;  %v2887_v8 = vunpack.i.l.bf16 %v2886_v40  ;;  %v4000_v33 = vpack.i.bf16 %v3894_v6, %v3892_v46  ;;  %v4003_v57 = vsel %vm409_vm1, %v485_v0, %v486_v55  ;;  %v574_v63 = vrot.slane %v3924_v20, 1 }
  0xb1   : > { %3175 = vrot.lane.b32.xlu1 %v3857_v49, %s3305_s19  ;;  %v1404_v25 = vsel %vm1303_vm4, %v1372_v23, %v2872_v38  ;;  %v1405_v36 = vsel %vm1303_vm4, %v1373_v62, %v2873_v2  ;;  %v488_v49 = vrot.slane %v4619_v12, 1 }
  0xb2   : > { %v2881_v13 = vpop.permute.xlu0 %2880  ;;  %v2896_v17 = vpop.permute.xlu1 %2895  ;;  %v1439_v52 = vpack.c.bf16 %v1405_v36, %v1404_v25  ;;  %v1244_v23 = vsel %vm1237_vm2, %v3450_v61, %v2887_v8 }
  0xb3   : > { %v2883_v44 = vunpack.i.h.bf16 %v2881_v13  ;;  %v2882_v27 = vunpack.i.l.bf16 %v2881_v13  ;;  %v4006_v58 = vsel %vm409_vm1, %v486_v55, %v488_v49  ;;  %v2898_v51 = vunpack.i.h.bf16 %v2896_v17 }
  0xb4   : > { %3170 = vrot.lane.b32.xlu0 %v3935_v5, %s3305_s19  ;;  %1720 = vmatprep.mubr.bf16.mxu0 %v1439_v52  ;;  %v2897_v40 = vunpack.i.l.bf16 %v2896_v17  ;;  %v4018_v37 = vpack.i.bf16 %v4006_v58, %v4003_v57  ;;  %v575_v13 = vrot.slane %v3926_v11, 1 }
  0xb5   : > { %3185 = vrot.lane.b32.xlu1 %v3867_v35, %s3304_s18  ;;  %1721 = vmatmul.mubr.bf16.gmra.mrb[8].mxu0 %v1438_v18  ;;  %v1245_v35 = vsel %vm1237_vm2, %v3461_v1, %v2888_v9  ;;  %v4620_v1 = vunpack.c.l.bf16 %v3909_v32  ;;  %v1343_v61 = vsel %vm1237_vm2, %v3537_v42, %v2883_v44  ;;  %v1342_v52 = vsel %vm1237_vm2, %v3534_v41, %v2882_v27  ;;  %v304_v27 = vld [vmem:[%s3370_s12 + $0xcc] sm:$0xff]  }
  0xb6   : > { %v2891_v26 = vpop.permute.xlu0 %2890  ;;  %v2906_v10 = vpop.permute.xlu1 %2905  ;;  %v1277_v55 = vsel %vm1270_vm3, %v1244_v23, %v2897_v40  ;;  %v1278_v12 = vsel %vm1270_vm3, %v1245_v35, %v2898_v51  ;;  %v306_v51 = vld [vmem:[%s3370_s12 + $0xd4] sm:$0x1]  ;;  %v4055_v35 = vsel %vm409_vm1, %v574_v63, %v575_v13 }
  0xb7   : > { %v2893_v2 = vunpack.i.h.bf16 %v2891_v26  ;;  %v2892_v38 = vunpack.i.l.bf16 %v2891_v26  ;;  %v2908_v62 = vunpack.i.h.bf16 %v2906_v10  ;;  %v2907_v24 = vunpack.i.l.bf16 %v2906_v10 }
  0xb8   : > { %3180 = vrot.lane.b32.xlu0 %v3994_v30, %s3304_s18  ;;  %v577_v17 = vrot.slane %v4620_v1, 1 }
  0xb9   : > { %3195 = vrot.lane.b32.xlu1 %v3869_v47, %s3303_s15  ;;  %v1374_v49 = vsel %vm1270_vm3, %v1342_v52, %v2892_v38  ;;  %v1375_v18 = vsel %vm1270_vm3, %v1343_v61, %v2893_v2  ;;  %v1310_v32 = vsel %vm1303_vm4, %v1277_v55, %v2907_v24  ;;  %v1311_v9 = vsel %vm1303_vm4, %v1278_v12, %v2908_v62 }
  0xba   : > { %v2901_v25 = vpop.permute.xlu0 %2900  ;;  %v2916_v36 = vpop.permute.xlu1 %2915  ;;  %v1441_v40 = vpack.c.bf16 %v1311_v9, %v1310_v32  ;;  %v4050_v2 = vpack.i.bf16 %v3926_v11, %v3924_v20  ;;  %v4058_v23 = vsel %vm409_vm1, %v575_v13, %v577_v17  ;;  %v4060_v62 = vunpack.c.l.bf16 %v304_v27 }
  0xbb   : > { %v2903_v47 = vunpack.i.h.bf16 %v2901_v25  ;;  %v2902_v0 = vunpack.i.l.bf16 %v2901_v25  ;;  %v2917_v8 = vunpack.i.l.bf16 %v2916_v36  ;;  %v2918_v38 = vunpack.i.h.bf16 %v2916_v36 }
  0xbc   : > { %3190 = vrot.lane.b32.xlu0 %v4000_v33, %s3303_s15  ;;  %v4064_v11 = vunpack.c.h.bf16 %v304_v27  ;;  %v360_v25 = vunpack.c.l.bf16 %v306_v51  ;;  %v624_v13 = vrot.slane %v4060_v62, 2 }
  0xbd   : > { %3205 = vrot.lane.b32.xlu1 %v3873_v22, %s3305_s19  ;;  %v1406_v41 = vsel %vm1303_vm4, %v1374_v49, %v2902_v0  ;;  %v1407_v42 = vsel %vm1303_vm4, %v1375_v18, %v2903_v47  ;;  %v4046_v22 = vpack.i.bf16 %v3949_v59, %v3946_v43  ;;  %v1246_v43 = vsel %vm1237_vm2, %v3512_v31, %v2917_v8 }
  0xbe   : > { %v2911_v26 = vpop.permute.xlu0 %2910  ;;  %v2926_v10 = vpop.permute.xlu1 %2925  ;;  %v1442_v44 = vpack.c.bf16 %v1407_v42, %v1406_v41  ;;  %v625_v17 = vrot.slane %v4064_v11, 2  ;;  %v627_v31 = vrot.slane %v360_v25, 2  ;;  %v1247_v52 = vsel %vm1237_vm2, %v3520_v34, %v2918_v38 }
  0xbf   : > { %v2913_v59 = vunpack.i.h.bf16 %v2911_v26  ;;  %v2912_v36 = vunpack.i.l.bf16 %v2911_v26  ;;  %v2927_v1 = vunpack.i.l.bf16 %v2926_v10  ;;  %v3229_v18 = vpack.i.bf16 %v4058_v23, %v4055_v35 }
  0xc0   : > { %3200 = vrot.lane.b32.xlu0 %v4018_v37, %s3305_s19  ;;  %1728 = vmatprep.mubr.bf16.mxu0 %v1442_v44  ;;  %v626_v41 = vsel %vm490_vm0, %v624_v13, %v625_v17  ;;  %v628_v42 = vsel %vm490_vm0, %v625_v17, %v627_v31 }
  0xc1   : > { %3215 = vrot.lane.b32.xlu1 %v3935_v5, %s3304_s18  ;;  %1729 = vmatmul.mubr.bf16.gmra.mrb[12].mxu0 %v1441_v40  ;;  %v2928_v5 = vunpack.i.h.bf16 %v2926_v10  ;;  %v1345_v55 = vsel %vm1237_vm2, %v3571_v4, %v2913_v59  ;;  %v1344_v34 = vsel %vm1237_vm2, %v3568_v3, %v2912_v36  ;;  %v1279_v32 = vsel %vm1270_vm3, %v1246_v43, %v2927_v1 }
  0xc2   : > { %v2921_v24 = vpop.permute.xlu0 %2920  ;;  %v2936_v20 = vpop.permute.xlu1 %2935  ;;  %v1479_v10 = vpack.c.bf16 %v628_v42, %v626_v41  ;;  %v619_v59 = vrot.slane %v4060_v62, 1  ;;  %v622_v36 = vrot.slane %v360_v25, 1  ;;  %v3239_v1 = vpack.i.bf16 %v3963_v7, %v3960_v60 }
  0xc3   : > { %v2923_v63 = vunpack.i.h.bf16 %v2921_v24  ;;  %v2922_v61 = vunpack.i.l.bf16 %v2921_v24  ;;  %v2938_v47 = vunpack.i.h.bf16 %v2936_v20  ;;  %v2937_v0 = vunpack.i.l.bf16 %v2936_v20 }
  0xc4   : > { %3210 = vrot.lane.b32.xlu0 %v4046_v22, %s3304_s18  ;;  %v620_v24 = vrot.slane %v4064_v11, 1  ;;  %2726 = vmatmul.mubr.msk.bf16.gmra.mrb[28].mxu1 %vm1237_vm2, %v1479_v10 }
  0xc5   : > { %3225 = vrot.lane.b32.xlu1 %v3994_v30, %s3303_s15  ;;  %v1280_v30 = vsel %vm1270_vm3, %v1247_v52, %v2928_v5  ;;  %v1376_v4 = vsel %vm1270_vm3, %v1344_v34, %v2922_v61  ;;  %v1377_v26 = vsel %vm1270_vm3, %v1345_v55, %v2923_v63  ;;  %v1312_v27 = vsel %vm1303_vm4, %v1279_v32, %v2937_v0 }
  0xc6   : > { %v2931_v12 = vpop.permute.xlu0 %2930  ;;  %v2946_v49 = vpop.permute.xlu1 %2945  ;;  %v1313_v51 = vsel %vm1303_vm4, %v1280_v30, %v2938_v47  ;;  %v3249_v63 = vpack.i.bf16 %v4064_v11, %v4060_v62  ;;  %v621_v52 = vsel %vm409_vm1, %v619_v59, %v620_v24  ;;  %v623_v60 = vsel %vm409_vm1, %v620_v24, %v622_v36 }
  0xc7   : > { %v2933_v9 = vunpack.i.h.bf16 %v2931_v12  ;;  %v2932_v8 = vunpack.i.l.bf16 %v2931_v12  ;;  %v2947_v20 = vunpack.i.l.bf16 %v2946_v49  ;;  %v1444_v5 = vpack.c.bf16 %v1313_v51, %v1312_v27  ;;  %v3287_v12 = vld [vmem:[%s4565_s4] sm:$0xff]  }
  0xc8   : > { %3220 = vrot.lane.b32.xlu0 %v4050_v2, %s3303_s15  ;;  %v3259_v42 = vpack.i.bf16 %v623_v60, %v621_v52  ;;  %2729 = vmatprep.subr.bf16.mxu1 %v3287_v12 }
  0xc9   : > { %3235 = vrot.lane.b32.xlu1 %v4000_v33, %s3305_s19  ;;  %v1408_v44 = vsel %vm1303_vm4, %v1376_v4, %v2932_v8  ;;  %v1409_v3 = vsel %vm1303_vm4, %v1377_v26, %v2933_v9  ;;  %v2948_v33 = vunpack.i.h.bf16 %v2946_v49  ;;  %v1248_v47 = vsel %vm1237_vm2, %v3546_v48, %v2947_v20  ;;  %2730 = vmatpush3.bf16.msra.mxu1 %v3287_v12 }
  0xca   : > { %v2941_v40 = vpop.permute.xlu0 %2940  ;;  %v2956_v38 = vpop.permute.xlu1 %2955  ;;  %v1445_v43 = vpack.c.bf16 %v1409_v3, %v1408_v44 }
  0xcb   : > { %v2943_v61 = vunpack.i.h.bf16 %v2941_v40  ;;  %v2942_v13 = vunpack.i.l.bf16 %v2941_v40  ;;  %v2957_v17 = vunpack.i.l.bf16 %v2956_v38  ;;  %v2958_v0 = vunpack.i.h.bf16 %v2956_v38 }
  0xcc   : > { %3230 = vrot.lane.b32.xlu0 %v3229_v18, %s3305_s19  ;;  %1736 = vmatprep.mubr.bf16.mxu0 %v1445_v43  ;;  %v1249_v7 = vsel %vm1237_vm2, %v3554_v53, %v2948_v33 }
  0xcd   : > { %3245 = vrot.lane.b32.xlu1 %v4018_v37, %s3304_s18  ;;  %1737 = vmatmul.mubr.bf16.gmra.mrb[16].mxu0 %v1444_v5  ;;  %v1347_v48 = vsel %vm1237_vm2, %v3600_v19, %v2943_v61  ;;  %v1346_v49 = vsel %vm1237_vm2, %v3595_v29, %v2942_v13  ;;  %v1281_v53 = vsel %vm1270_vm3, %v1248_v47, %v2957_v17  ;;  %v4621_v61 = vld [vmem:[#allocation5_spill] sm:$0xff]  ;;  %v4622_v17 = vld [vmem:[#allocation4_spill] sm:$0xff] }
  0xce   : > { %v2951_v31 = vpop.permute.xlu0 %2950  ;;  %v2966_v25 = vpop.permute.xlu1 %2965  ;;  %v1282_v34 = vsel %vm1270_vm3, %v1249_v7, %v2958_v0 }
  0xcf   : > { %v2952_v55 = vunpack.i.l.bf16 %v2951_v31  ;;  %v2953_v37 = vunpack.i.h.bf16 %v2951_v31  ;;  %v2968_v62 = vunpack.i.h.bf16 %v2966_v25  ;;  %v2967_v11 = vunpack.i.l.bf16 %v2966_v25 }
  0xd0   : > { %3240 = vrot.lane.b32.xlu0 %v3239_v1, %s3304_s18  ;;  %s4492_s18 = scalar_lea.vmem %s4567_s6, %s2494_s24 }
  0xd1   : > { %3255 = vrot.lane.b32.xlu1 %v4046_v22, %s3303_s15  ;;  %v1378_v32 = vsel %vm1270_vm3, %v1346_v49, %v2952_v55  ;;  %v1379_v8 = vsel %vm1270_vm3, %v1347_v48, %v2953_v37  ;;  %v1314_v19 = vsel %vm1303_vm4, %v1281_v53, %v2967_v11  ;;  %v1315_v29 = vsel %vm1303_vm4, %v1282_v34, %v2968_v62 }
  0xd2   : > { %v2961_v18 = vpop.permute.xlu0 %2960  ;;  %v2976_v41 = vpop.permute.xlu1 %2975  ;;  %v1447_v51 = vpack.c.bf16 %v1315_v29, %v1314_v19  ;;  %v4624_v19 = vld [vmem:[#allocation2_spill] sm:$0xff] }
  0xd3   : > { %v2963_v22 = vunpack.i.h.bf16 %v2961_v18  ;;  %v2962_v9 = vunpack.i.l.bf16 %v2961_v18  ;;  %v2978_v3 = vunpack.i.h.bf16 %v2976_v41  ;;  %v2977_v27 = vunpack.i.l.bf16 %v2976_v41 }
  0xd4   : > { %3250 = vrot.lane.b32.xlu0 %v3249_v63, %s3303_s15 }
  0xd5   : > { %3265 = vrot.lane.b32.xlu1 %v4050_v2, %s3305_s19  ;;  %v1410_v30 = vsel %vm1303_vm4, %v1378_v32, %v2962_v9  ;;  %v1411_v4 = vsel %vm1303_vm4, %v1379_v8, %v2963_v22  ;;  %v1251_v2 = vsel %vm1237_vm2, %v3582_v15, %v2978_v3  ;;  %v1250_v24 = vsel %vm1237_vm2, %v3580_v14, %v2977_v27  ;;  %v4623_v9 = vld [vmem:[#allocation3_spill] sm:$0xff] }
  0xd6   : > { %v2971_v26 = vpop.permute.xlu0 %2970  ;;  %v2986_v10 = vpop.permute.xlu1 %2985  ;;  %v1448_v44 = vpack.c.bf16 %v1411_v4, %v1410_v30  ;;  %v4625_v27 = vld [vmem:[#allocation11_spill] sm:$0xff] }
  0xd7   : > { %v2973_v40 = vunpack.i.h.bf16 %v2971_v26  ;;  %v2972_v38 = vunpack.i.l.bf16 %v2971_v26  ;;  %v2988_v20 = vunpack.i.h.bf16 %v2986_v10  ;;  %v2987_v36 = vunpack.i.l.bf16 %v2986_v10 }
  0xd8   : > { %3260 = vrot.lane.b32.xlu0 %v3259_v42, %s3305_s19  ;;  %1744 = vmatprep.mubr.bf16.mxu0 %v1448_v44 }
  0xd9   : > { %1745 = vmatmul.mubr.bf16.gmra.mrb[20].mxu0 %v1447_v51  ;;  %v1349_v13 = vsel %vm1237_vm2, %v4621_v61, %v2973_v40  ;;  %v1348_v31 = vsel %vm1237_vm2, %v4622_v17, %v2972_v38  ;;  %v1283_v47 = vsel %vm1270_vm3, %v1250_v24, %v2987_v36  ;;  %v1284_v15 = vsel %vm1270_vm3, %v1251_v2, %v2988_v20  ;;  %v4626_v40 = vld [vmem:[#allocation10_spill] sm:$0xff] }
  0xda   : > { %v2981_v43 = vpop.permute.xlu0 %2980  ;;  %v2996_v59 = vpop.permute.xlu1 %2995 }
  0xdb   : > { %v2983_v33 = vunpack.i.h.bf16 %v2981_v43  ;;  %v2982_v5 = vunpack.i.l.bf16 %v2981_v43  ;;  %v2998_v1 = vunpack.i.h.bf16 %v2996_v59  ;;  %v2997_v63 = vunpack.i.l.bf16 %v2996_v59 }
  0xdd   : > { %v1380_v55 = vsel %vm1270_vm3, %v1348_v31, %v2982_v5  ;;  %v1381_v60 = vsel %vm1270_vm3, %v1349_v13, %v2983_v33  ;;  %v1316_v7 = vsel %vm1303_vm4, %v1283_v47, %v2997_v63  ;;  %v1317_v37 = vsel %vm1303_vm4, %v1284_v15, %v2998_v1 }
  0xde   : > { %v2991_v25 = vpop.permute.xlu0 %2990  ;;  %v3006_v52 = vpop.permute.xlu1 %3005  ;;  %v1450_v41 = vpack.c.bf16 %v1317_v37, %v1316_v7  ;;  %v4627_v37 = vld [vmem:[#allocation7_spill] sm:$0xff] }
  0xdf   : > { %v2993_v0 = vunpack.i.h.bf16 %v2991_v25  ;;  %v2992_v14 = vunpack.i.l.bf16 %v2991_v25  ;;  %v3008_v53 = vunpack.i.h.bf16 %v3006_v52  ;;  %v3007_v18 = vunpack.i.l.bf16 %v3006_v52 }
  0xe1   : > { %v1412_v62 = vsel %vm1303_vm4, %v1380_v55, %v2992_v14  ;;  %v1413_v11 = vsel %vm1303_vm4, %v1381_v60, %v2993_v0  ;;  %v1253_v8 = vsel %vm1237_vm2, %v4623_v9, %v3008_v53  ;;  %v1252_v29 = vsel %vm1237_vm2, %v4624_v19, %v3007_v18  ;;  %v3288_v0 = vld [vmem:[%s4565_s4 + $0x8] sm:$0xff]   ;;  %v4630_v9 = vld [vmem:[#allocation12_spill] sm:$0xff] }
  0xe2   : > { %v3001_v12 = vpop.permute.xlu0 %3000  ;;  %v3016_v48 = vpop.permute.xlu1 %3015  ;;  %v1451_v49 = vpack.c.bf16 %v1413_v11, %v1412_v62  ;;  %2731 = vmatprep.subr.bf16.mxu1 %v3288_v0  ;;  %v4628_v11 = vld [vmem:[#allocation6_spill] sm:$0xff] }
  0xe3   : > { %v3003_v42 = vunpack.i.h.bf16 %v3001_v12  ;;  %v3002_v34 = vunpack.i.l.bf16 %v3001_v12  ;;  %v3018_v30 = vunpack.i.h.bf16 %v3016_v48  ;;  %v3017_v4 = vunpack.i.l.bf16 %v3016_v48  ;;  %2732 = vmatpush3.bf16.msra.mxu1 %v3288_v0 }
  0xe4   : > { %1752 = vmatprep.mubr.bf16.mxu0 %v1451_v49 }
  0xe5   : > { %1753 = vmatmul.mubr.bf16.gmra.mrb[24].mxu0 %v1450_v41  ;;  %v1351_v51 = vsel %vm1237_vm2, %v4625_v27, %v3003_v42  ;;  %v1350_v38 = vsel %vm1237_vm2, %v4626_v40, %v3002_v34  ;;  %v1285_v2 = vsel %vm1270_vm3, %v1252_v29, %v3017_v4  ;;  %v1286_v24 = vsel %vm1270_vm3, %v1253_v8, %v3018_v30  ;;  %v3289_v34 = vld [vmem:[%s4565_s4 + $0x10] sm:$0xff]   ;;  %v3290_v40 = vld [vmem:[%s4565_s4 + $0x18] sm:$0xff]  }
  0xe6   : > { %v3011_v32 = vpop.permute.xlu0 %3010  ;;  %v3026_v22 = vpop.permute.xlu1 %3025  ;;  %2733 = vmatprep.subr.bf16.mxu1 %v3289_v34 }
  0xe7   : > { %v3013_v26 = vunpack.i.h.bf16 %v3011_v32  ;;  %v3012_v10 = vunpack.i.l.bf16 %v3011_v32  ;;  %v3028_v44 = vunpack.i.h.bf16 %v3026_v22  ;;  %v3027_v3 = vunpack.i.l.bf16 %v3026_v22  ;;  %v4629_v32 = vld [vmem:[#allocation13_spill] sm:$0xff]  ;;  %2734 = vmatpush3.bf16.msra.mxu1 %v3289_v34 }
  0xe8   : > { %2735 = vmatprep.subr.bf16.mxu1 %v3290_v40 }
  0xe9   : > { %v1382_v33 = vsel %vm1270_vm3, %v1350_v38, %v3012_v10  ;;  %v1383_v5 = vsel %vm1270_vm3, %v1351_v51, %v3013_v26  ;;  %v1318_v1 = vsel %vm1303_vm4, %v1285_v2, %v3027_v3  ;;  %v1319_v63 = vsel %vm1303_vm4, %v1286_v24, %v3028_v44 }
  0xea   : > { %v3021_v43 = vpop.permute.xlu0 %3020  ;;  %v3036_v59 = vpop.permute.xlu1 %3035  ;;  %v1453_v15 = vpack.c.bf16 %v1319_v63, %v1318_v1 }
  0xeb   : > { %v3023_v20 = vunpack.i.h.bf16 %v3021_v43  ;;  %v3022_v36 = vunpack.i.l.bf16 %v3021_v43  ;;  %v3038_v52 = vunpack.i.h.bf16 %v3036_v59  ;;  %v3037_v47 = vunpack.i.l.bf16 %v3036_v59  ;;  %2736 = vmatpush3.bf16.msra.mxu1 %v3290_v40 }
  0xed   : > { %v1414_v61 = vsel %vm1303_vm4, %v1382_v33, %v3022_v36  ;;  %v1415_v13 = vsel %vm1303_vm4, %v1383_v5, %v3023_v20  ;;  %v1255_v62 = vsel %vm1237_vm2, %v4627_v37, %v3038_v52  ;;  %v1254_v12 = vsel %vm1237_vm2, %v4628_v11, %v3037_v47  ;;  %v3291_v5 = vld [vmem:[%s4565_s4 + $0x20] sm:$0xff]   ;;  %v4633_v37 = vld [vmem:[#allocation19_spill] sm:$0xff] }
  0xee   : > { %v3031_v17 = vpop.permute.xlu0 %3030  ;;  %v3046_v31 = vpop.permute.xlu1 %3045  ;;  %v1454_v25 = vpack.c.bf16 %v1415_v13, %v1414_v61  ;;  %2737 = vmatprep.subr.bf16.mxu1 %v3291_v5  ;;  %v4634_v11 = vld [vmem:[#allocation18_spill] sm:$0xff] }
  0xef   : > { %v3033_v14 = vunpack.i.h.bf16 %v3031_v17  ;;  %v3032_v55 = vunpack.i.l.bf16 %v3031_v17  ;;  %v3048_v48 = vunpack.i.h.bf16 %v3046_v31  ;;  %v3047_v49 = vunpack.i.l.bf16 %v3046_v31  ;;  %v4631_v17 = vld [vmem:[#allocation9_spill] sm:$0xff]  ;;  %2738 = vmatpush3.bf16.msra.mxu1 %v3291_v5 }
  0xf0   : > { %1760 = vmatprep.mubr.bf16.mxu0 %v1454_v25  ;;  %v4632_v25 = vld [vmem:[#allocation8_spill] sm:$0xff] }
  0xf1   : > { %1761 = vmatmul.mubr.bf16.gmra.mrb[28].mxu0 %v1453_v15  ;;  %v1353_v22 = vsel %vm1237_vm2, %v4629_v32, %v3033_v14  ;;  %v1352_v8 = vsel %vm1237_vm2, %v4630_v9, %v3032_v55  ;;  %v1287_v30 = vsel %vm1270_vm3, %v1254_v12, %v3047_v49  ;;  %v1288_v4 = vsel %vm1270_vm3, %v1255_v62, %v3048_v48 }
  0xf2   : > { %v3041_v60 = vpop.permute.xlu0 %3040  ;;  %v3056_v7 = vpop.permute.xlu1 %3055 }
  0xf3   : > { %v3043_v53 = vunpack.i.h.bf16 %v3041_v60  ;;  %v3042_v18 = vunpack.i.l.bf16 %v3041_v60  ;;  %v3058_v41 = vunpack.i.h.bf16 %v3056_v7  ;;  %v3057_v42 = vunpack.i.l.bf16 %v3056_v7  ;;  %v3292_v7 = vld [vmem:[%s4565_s4 + $0x28] sm:$0xff]  }
  0xf4   : > { %2739 = vmatprep.subr.bf16.mxu1 %v3292_v7 }
  0xf5   : > { %v1384_v44 = vsel %vm1270_vm3, %v1352_v8, %v3042_v18  ;;  %v1385_v3 = vsel %vm1270_vm3, %v1353_v22, %v3043_v53  ;;  %v1320_v27 = vsel %vm1303_vm4, %v1287_v30, %v3057_v42  ;;  %v1321_v51 = vsel %vm1303_vm4, %v1288_v4, %v3058_v41  ;;  %2740 = vmatpush3.bf16.msra.mxu1 %v3292_v7  ;;  %v3293_v8 = vld [vmem:[%s4565_s4 + $0x30] sm:$0xff]  }
  0xf6   : > { %v3051_v19 = vpop.permute.xlu0 %3050  ;;  %v3066_v29 = vpop.permute.xlu1 %3065  ;;  %v1456_v33 = vpack.c.bf16 %v1321_v51, %v1320_v27  ;;  %2741 = vmatprep.subr.bf16.mxu1 %v3293_v8  ;;  %v3294_v27 = vld [vmem:[%s4565_s4 + $0x38] sm:$0xff]  }
  0xf7   : > { %v3053_v26 = vunpack.i.h.bf16 %v3051_v19  ;;  %v3052_v10 = vunpack.i.l.bf16 %v3051_v19  ;;  %v3068_v20 = vunpack.i.h.bf16 %v3066_v29  ;;  %v3067_v36 = vunpack.i.l.bf16 %v3066_v29 }
  0xf9   : > { %v1416_v38 = vsel %vm1303_vm4, %v1384_v44, %v3052_v10  ;;  %v1417_v43 = vsel %vm1303_vm4, %v1385_v3, %v3053_v26  ;;  %v1257_v31 = vsel %vm1237_vm2, %v4631_v17, %v3068_v20  ;;  %v1256_v52 = vsel %vm1237_vm2, %v4632_v25, %v3067_v36  ;;  %2742 = vmatpush3.bf16.msra.mxu1 %v3293_v8 }
  0xfa   : > { %v3061_v59 = vpop.permute.xlu0 %3060  ;;  %v3076_v2 = vpop.permute.xlu1 %3075  ;;  %v1457_v24 = vpack.c.bf16 %v1417_v43, %v1416_v38  ;;  %2743 = vmatprep.subr.bf16.mxu1 %v3294_v27 }
  0xfb   : > { %v3063_v1 = vunpack.i.h.bf16 %v3061_v59  ;;  %v3062_v63 = vunpack.i.l.bf16 %v3061_v59  ;;  %v3078_v47 = vunpack.i.h.bf16 %v3076_v2  ;;  %v3077_v15 = vunpack.i.l.bf16 %v3076_v2  ;;  %v4635_v59 = vld [vmem:[#allocation15_spill] sm:$0xff] }
  0xfc   : > { %1768 = vmatprep.mubr.bf16.mxu0 %v1457_v24  ;;  %v4636_v24 = vld [vmem:[#allocation14_spill] sm:$0xff] }
  0xfd   : > { %1769 = vmatmul.mubr.bf16.gmra.mrb[32].mxu0 %v1456_v33  ;;  %v1355_v62 = vsel %vm1237_vm2, %v4633_v37, %v3063_v1  ;;  %v1354_v12 = vsel %vm1237_vm2, %v4634_v11, %v3062_v63  ;;  %v1289_v53 = vsel %vm1270_vm3, %v1256_v52, %v3077_v15  ;;  %v1290_v18 = vsel %vm1270_vm3, %v1257_v31, %v3078_v47  ;;  %v4638_v31 = vld [vmem:[#allocation22_spill] sm:$0xff] }
  0xfe   : > { %v3071_v61 = vpop.permute.xlu0 %3070  ;;  %v3086_v13 = vpop.permute.xlu1 %3085  ;;  %2744 = vmatpush3.bf16.msra.mxu1 %v3294_v27 }
  0xff   : > { %v3073_v0 = vunpack.i.h.bf16 %v3071_v61  ;;  %v3072_v14 = vunpack.i.l.bf16 %v3071_v61  ;;  %v3088_v55 = vunpack.i.h.bf16 %v3086_v13  ;;  %v3087_v60 = vunpack.i.l.bf16 %v3086_v13  ;;  %v4637_v13 = vld [vmem:[#allocation23_spill] sm:$0xff] }
 0x101   : > { %v1386_v34 = vsel %vm1270_vm3, %v1354_v12, %v3072_v14  ;;  %v1387_v32 = vsel %vm1270_vm3, %v1355_v62, %v3073_v0  ;;  %v1322_v22 = vsel %vm1303_vm4, %v1289_v53, %v3087_v60  ;;  %v1323_v9 = vsel %vm1303_vm4, %v1290_v18, %v3088_v55 }
 0x102   : > { %v3081_v48 = vpop.permute.xlu0 %3080  ;;  %v3096_v49 = vpop.permute.xlu1 %3095  ;;  %v1459_v3 = vpack.c.bf16 %v1323_v9, %v1322_v22  ;;  %v4639_v9 = vld [vmem:[#allocation17_spill] sm:$0xff] }
 0x103   : > { %v3083_v41 = vunpack.i.h.bf16 %v3081_v48  ;;  %v3082_v42 = vunpack.i.l.bf16 %v3081_v48  ;;  %v3098_v10 = vunpack.i.h.bf16 %v3096_v49  ;;  %v3097_v44 = vunpack.i.l.bf16 %v3096_v49 }
 0x105   : > { %v1418_v19 = vsel %vm1303_vm4, %v1386_v34, %v3082_v42  ;;  %v1419_v29 = vsel %vm1303_vm4, %v1387_v32, %v3083_v41  ;;  %v1259_v2 = vsel %vm1237_vm2, %v4635_v59, %v3098_v10  ;;  %v1258_v20 = vsel %vm1237_vm2, %v4636_v24, %v3097_v44 }
 0x106   : > { %v3091_v30 = vpop.permute.xlu0 %3090  ;;  %v3106_v4 = vpop.permute.xlu1 %3105  ;;  %v1460_v26 = vpack.c.bf16 %v1419_v29, %v1418_v19  ;;  %v4640_v19 = vld [vmem:[#allocation16_spill] sm:$0xff] }
 0x107   : > { %v3093_v51 = vunpack.i.h.bf16 %v3091_v30  ;;  %v3092_v40 = vunpack.i.l.bf16 %v3091_v30  ;;  %v3108_v36 = vunpack.i.h.bf16 %v3106_v4  ;;  %v3107_v33 = vunpack.i.l.bf16 %v3106_v4 }
 0x108   : > { %1776 = vmatprep.mubr.bf16.mxu0 %v1460_v26 }
 0x109   : > { %1777 = vmatmul.mubr.bf16.gmra.mrb[36].mxu0 %v1459_v3  ;;  %v1357_v17 = vsel %vm1237_vm2, %v4637_v13, %v3093_v51  ;;  %v1356_v25 = vsel %vm1237_vm2, %v4638_v31, %v3092_v40  ;;  %v1291_v47 = vsel %vm1270_vm3, %v1258_v20, %v3107_v33  ;;  %v1292_v15 = vsel %vm1270_vm3, %v1259_v2, %v3108_v36  ;;  %v4641_v51 = vld [vmem:[#allocation25_spill] sm:$0xff] }
 0x10a   : > { %v3101_v38 = vpop.permute.xlu0 %3100  ;;  %v3116_v43 = vpop.permute.xlu1 %3115 }
 0x10b   : > { %v3103_v5 = vunpack.i.h.bf16 %v3101_v38  ;;  %v3102_v1 = vunpack.i.l.bf16 %v3101_v38  ;;  %v3118_v63 = vunpack.i.h.bf16 %v3116_v43  ;;  %v3117_v61 = vunpack.i.l.bf16 %v3116_v43  ;;  %v4642_v38 = vld [vmem:[#allocation24_spill] sm:$0xff] }
 0x10d   : > { %v1388_v60 = vsel %vm1270_vm3, %v1356_v25, %v3102_v1  ;;  %v1389_v7 = vsel %vm1270_vm3, %v1357_v17, %v3103_v5  ;;  %v1324_v37 = vsel %vm1303_vm4, %v1291_v47, %v3117_v61  ;;  %v1325_v62 = vsel %vm1303_vm4, %v1292_v15, %v3118_v63 }
 0x10e   : > { %v3111_v52 = vpop.permute.xlu0 %3110  ;;  %v1462_v42 = vpack.c.bf16 %v1325_v62, %v1324_v37  ;;  %v4644_v62 = vld [vmem:[#allocation20_spill] sm:$0xff] }
 0x10f   : > { %v3113_v0 = vunpack.i.h.bf16 %v3111_v52  ;;  %v3112_v14 = vunpack.i.l.bf16 %v3111_v52  ;;  %v3126_v55 = vpop.permute.xlu1 %3125 }
 0x110   : > { %v3128_v53 = vunpack.i.h.bf16 %v3126_v55  ;;  %v3127_v18 = vunpack.i.l.bf16 %v3126_v55 }
 0x111   : > { %v1420_v11 = vsel %vm1303_vm4, %v1388_v60, %v3112_v14  ;;  %v1421_v12 = vsel %vm1303_vm4, %v1389_v7, %v3113_v0  ;;  %v4643_v7 = vld [vmem:[#allocation21_spill] sm:$0xff] }
 0x112   : > { %v3121_v48 = vpop.permute.xlu0 %3120  ;;  %v1463_v49 = vpack.c.bf16 %v1421_v12, %v1420_v11  ;;  %v1261_v8 = vsel %vm1237_vm2, %v4639_v9, %v3128_v53  ;;  %v1260_v29 = vsel %vm1237_vm2, %v4640_v19, %v3127_v18 }
 0x113   : > { %v3136_v41 = vpop.permute.xlu1 %3135  ;;  %v3123_v34 = vunpack.i.h.bf16 %v3121_v48  ;;  %v3122_v32 = vunpack.i.l.bf16 %v3121_v48 }
 0x114   : > { %1784 = vmatprep.mubr.bf16.mxu0 %v1463_v49  ;;  %v3138_v30 = vunpack.i.h.bf16 %v3136_v41  ;;  %v3137_v4 = vunpack.i.l.bf16 %v3136_v41 }
 0x115   : > { %1785 = vmatmul.mubr.bf16.gmra.mrb[40].mxu0 %v1462_v42  ;;  %v1359_v40 = vsel %vm1237_vm2, %v4641_v51, %v3123_v34  ;;  %v1358_v43 = vsel %vm1237_vm2, %v4642_v38, %v3122_v32 }
 0x116   : > { %v3131_v22 = vpop.permute.xlu0 %3130  ;;  %v1293_v2 = vsel %vm1270_vm3, %v1260_v29, %v3137_v4  ;;  %v1294_v24 = vsel %vm1270_vm3, %v1261_v8, %v3138_v30 }
 0x117   : > { %v3146_v26 = vpop.permute.xlu1 %3145  ;;  %v3133_v10 = vunpack.i.h.bf16 %v3131_v22  ;;  %v3132_v44 = vunpack.i.l.bf16 %v3131_v22 }
 0x118   : > { %v3148_v3 = vunpack.i.h.bf16 %v3146_v26  ;;  %v3147_v27 = vunpack.i.l.bf16 %v3146_v26 }
 0x119   : > { %v1390_v5 = vsel %vm1270_vm3, %v1358_v43, %v3132_v44  ;;  %v1391_v1 = vsel %vm1270_vm3, %v1359_v40, %v3133_v10  ;;  %v4253_v34 = vpop.f32.mrb[0].mxu1 }
 0x11a   : > { %v3141_v59 = vpop.permute.xlu0 %3140  ;;  %v1326_v63 = vsel %vm1303_vm4, %v1293_v2, %v3147_v27  ;;  %v1327_v61 = vsel %vm1303_vm4, %v1294_v24, %v3148_v3  ;;  %v4255_v32 = vpop.f32.mrb[1].mxu1 }
 0x11b   : > { %v3143_v20 = vunpack.i.h.bf16 %v3141_v59  ;;  %v3142_v36 = vunpack.i.l.bf16 %v3141_v59  ;;  %v3156_v33 = vpop.permute.xlu1 %3155  ;;  %v1465_v0 = vpack.c.bf16 %v1327_v61, %v1326_v63  ;;  %v4261_v19 = vpop.f32.mrb[2].mxu1 }
 0x11c   : > { %v3158_v52 = vunpack.i.h.bf16 %v3156_v33  ;;  %v3157_v47 = vunpack.i.l.bf16 %v3156_v33  ;;  %v4265_v44 = vpop.f32.mrb[3].mxu1 }
 0x11d   : > { %v1422_v13 = vsel %vm1303_vm4, %v1390_v5, %v3142_v36  ;;  %v1423_v17 = vsel %vm1303_vm4, %v1391_v1, %v3143_v20 }
 0x11e   : > { %v3151_v31 = vpop.permute.xlu0 %3150  ;;  %v1466_v25 = vpack.c.bf16 %v1423_v17, %v1422_v13  ;;  %v1263_v37 = vsel %vm1237_vm2, %v4643_v7, %v3158_v52  ;;  %v1262_v11 = vsel %vm1237_vm2, %v4644_v62, %v3157_v47 }
 0x11f   : > { %v3166_v15 = vpop.permute.xlu1 %3165  ;;  %v3153_v14 = vunpack.i.h.bf16 %v3151_v31  ;;  %v3152_v55 = vunpack.i.l.bf16 %v3151_v31 }
 0x120   : > { %1792 = vmatprep.mubr.bf16.mxu0 %v1466_v25  ;;  %v3168_v12 = vunpack.i.h.bf16 %v3166_v15  ;;  %v3167_v48 = vunpack.i.l.bf16 %v3166_v15 }
 0x121   : > { %1793 = vmatmul.mubr.bf16.gmra.mrb[44].mxu0 %v1465_v0  ;;  %v1361_v22 = vsel %vm1237_vm2, %v3850_v50, %v3153_v14  ;;  %v1360_v9 = vsel %vm1237_vm2, %v3847_v28, %v3152_v55 }
 0x122   : > { %v3161_v60 = vpop.permute.xlu0 %3160  ;;  %v1295_v29 = vsel %vm1270_vm3, %v1262_v11, %v3167_v48  ;;  %v1296_v30 = vsel %vm1270_vm3, %v1263_v37, %v3168_v12  ;;  %v4273_v36 = vpop.f32.mrb[4].mxu1 }
 0x123   : > { %v3176_v49 = vpop.permute.xlu1 %3175  ;;  %v3163_v53 = vunpack.i.h.bf16 %v3161_v60  ;;  %v3162_v18 = vunpack.i.l.bf16 %v3161_v60  ;;  %v4275_v63 = vpop.f32.mrb[5].mxu1 }
 0x124   : > { %v3178_v41 = vunpack.i.h.bf16 %v3176_v49  ;;  %v3177_v42 = vunpack.i.l.bf16 %v3176_v49  ;;  %v4281_v52 = vpop.f32.mrb[6].mxu1 }
 0x125   : > { %v1392_v3 = vsel %vm1270_vm3, %v1360_v9, %v3162_v18  ;;  %v1393_v27 = vsel %vm1270_vm3, %v1361_v22, %v3163_v53  ;;  %v4283_v55 = vpop.f32.mrb[7].mxu1 }
 0x126   : > { %v3171_v8 = vpop.permute.xlu0 %3170  ;;  %v1328_v50 = vsel %vm1303_vm4, %v1295_v29, %v3177_v42  ;;  %v1329_v28 = vsel %vm1303_vm4, %v1296_v30, %v3178_v41 }
 0x127   : > { %v3173_v4 = vunpack.i.h.bf16 %v3171_v8  ;;  %v3172_v26 = vunpack.i.l.bf16 %v3171_v8  ;;  %v3186_v10 = vpop.permute.xlu1 %3185  ;;  %v1468_v20 = vpack.c.bf16 %v1329_v28, %v1328_v50 }
 0x128   : > { %v3188_v59 = vunpack.i.h.bf16 %v3186_v10  ;;  %v3187_v2 = vunpack.i.l.bf16 %v3186_v10 }
 0x129   : > { %v1424_v51 = vsel %vm1303_vm4, %v1392_v3, %v3172_v26  ;;  %v1425_v40 = vsel %vm1303_vm4, %v1393_v27, %v3173_v4 }
 0x12a   : > { %v3181_v38 = vpop.permute.xlu0 %3180  ;;  %v1469_v43 = vpack.c.bf16 %v1425_v40, %v1424_v51  ;;  %v1265_v61 = vsel %vm1237_vm2, %v3791_v21, %v3188_v59  ;;  %v1264_v13 = vsel %vm1237_vm2, %v3783_v54, %v3187_v2  ;;  %v4297_v30 = vpop.f32.mrb[8].mxu1 }
 0x12b   : > { %v3196_v24 = vpop.permute.xlu1 %3195  ;;  %v3183_v33 = vunpack.i.h.bf16 %v3181_v38  ;;  %v3182_v5 = vunpack.i.l.bf16 %v3181_v38  ;;  %v4299_v4 = vpop.f32.mrb[9].mxu1 }
 0x12c   : > { %1800 = vmatprep.mubr.bf16.mxu0 %v1469_v43  ;;  %v3198_v17 = vunpack.i.h.bf16 %v3196_v24  ;;  %v3197_v31 = vunpack.i.l.bf16 %v3196_v24  ;;  %v4301_v27 = vpop.f32.mrb[10].mxu1 }
 0x12d   : > { %1801 = vmatmul.mubr.bf16.gmra.mrb[48].mxu0 %v1468_v20  ;;  %v1363_v60 = vsel %vm1237_vm2, %v3918_v56, %v3183_v33  ;;  %v1362_v21 = vsel %vm1237_vm2, %v3877_v39, %v3182_v5  ;;  %v4307_v43 = vpop.f32.mrb[11].mxu1 }
 0x12e   : > { %v3191_v1 = vpop.permute.xlu0 %3190  ;;  %v1297_v54 = vsel %vm1270_vm3, %v1264_v13, %v3197_v31  ;;  %v1298_v37 = vsel %vm1270_vm3, %v1265_v61, %v3198_v17 }
 0x12f   : > { %v3206_v25 = vpop.permute.xlu1 %3205  ;;  %v3193_v47 = vunpack.i.h.bf16 %v3191_v1  ;;  %v3192_v15 = vunpack.i.l.bf16 %v3191_v1 }
 0x130   : > { %v3208_v0 = vunpack.i.h.bf16 %v3206_v25  ;;  %v3207_v14 = vunpack.i.l.bf16 %v3206_v25 }
 0x131   : > { %v1394_v48 = vsel %vm1270_vm3, %v1362_v21, %v3192_v15  ;;  %v1395_v49 = vsel %vm1270_vm3, %v1363_v60, %v3193_v47 }
 0x132   : > { %v3201_v7 = vpop.permute.xlu0 %3200  ;;  %v1330_v53 = vsel %vm1303_vm4, %v1297_v54, %v3207_v14  ;;  %v1331_v18 = vsel %vm1303_vm4, %v1298_v37, %v3208_v0 }
 0x133   : > { %v3203_v62 = vunpack.i.h.bf16 %v3201_v7  ;;  %v3202_v11 = vunpack.i.l.bf16 %v3201_v7  ;;  %v3216_v12 = vpop.permute.xlu1 %3215  ;;  %v1471_v29 = vpack.c.bf16 %v1331_v18, %v1330_v53 }
 0x134   : > { %v3218_v22 = vunpack.i.h.bf16 %v3216_v12  ;;  %v3217_v9 = vunpack.i.l.bf16 %v3216_v12 }
 0x135   : > { %v1426_v56 = vsel %vm1303_vm4, %v1394_v48, %v3202_v11  ;;  %v1427_v39 = vsel %vm1303_vm4, %v1395_v49, %v3203_v62 }
 0x136   : > { %v3211_v41 = vpop.permute.xlu0 %3210  ;;  %v1472_v42 = vpack.c.bf16 %v1427_v39, %v1426_v56  ;;  %v1267_v50 = vsel %vm1237_vm2, %v3832_v16, %v3218_v22  ;;  %v1266_v28 = vsel %vm1237_vm2, %v3813_v45, %v3217_v9 }
 0x137   : > { %v3226_v8 = vpop.permute.xlu1 %3225  ;;  %v3213_v26 = vunpack.i.h.bf16 %v3211_v41  ;;  %v3212_v10 = vunpack.i.l.bf16 %v3211_v41 }
 0x138   : > { %1808 = vmatprep.mubr.bf16.mxu0 %v1472_v42  ;;  %v3228_v51 = vunpack.i.h.bf16 %v3226_v8  ;;  %v3227_v40 = vunpack.i.l.bf16 %v3226_v8 }
 0x139   : > { %1809 = vmatmul.mubr.bf16.gmra.mrb[52].mxu0 %v1471_v29  ;;  %v1365_v33 = vsel %vm1237_vm2, %v4006_v58, %v3213_v26  ;;  %v1364_v5 = vsel %vm1237_vm2, %v4003_v57, %v3212_v10 }
 0x13a   : > { %v3221_v3 = vpop.permute.xlu0 %3220  ;;  %v1299_v16 = vsel %vm1270_vm3, %v1266_v28, %v3227_v40  ;;  %v1300_v45 = vsel %vm1270_vm3, %v1267_v50, %v3228_v51  ;;  %v4319_v58 = vpop.f32.mrb[12].mxu1 }
 0x13b   : > { %v3236_v38 = vpop.permute.xlu1 %3235  ;;  %v3223_v59 = vunpack.i.h.bf16 %v3221_v3  ;;  %v3222_v2 = vunpack.i.l.bf16 %v3221_v3  ;;  %v4323_v14 = vpop.f32.mrb[13].mxu1 }
 0x13c   : > { %v3238_v24 = vunpack.i.h.bf16 %v3236_v38  ;;  %v3237_v20 = vunpack.i.l.bf16 %v3236_v38  ;;  %v4325_v7 = vpop.f32.mrb[14].mxu1 }
 0x13d   : > { %v1396_v31 = vsel %vm1270_vm3, %v1364_v5, %v3222_v2  ;;  %v1397_v25 = vsel %vm1270_vm3, %v1365_v33, %v3223_v59  ;;  %v4327_v12 = vpop.f32.mrb[15].mxu1 }
 0x13e   : > { %v3231_v1 = vpop.permute.xlu0 %3230  ;;  %v1332_v47 = vsel %vm1303_vm4, %v1299_v16, %v3237_v20  ;;  %v1333_v15 = vsel %vm1303_vm4, %v1300_v45, %v3238_v24 }
 0x13f   : > { %v3233_v61 = vunpack.i.h.bf16 %v3231_v1  ;;  %v3232_v13 = vunpack.i.l.bf16 %v3231_v1  ;;  %v3246_v17 = vpop.permute.xlu1 %3245  ;;  %v1474_v11 = vpack.c.bf16 %v1333_v15, %v1332_v47 }
 0x140   : > { %v3248_v54 = vunpack.i.h.bf16 %v3246_v17  ;;  %v3247_v37 = vunpack.i.l.bf16 %v3246_v17 }
 0x141   : > { %v1428_v57 = vsel %vm1303_vm4, %v1396_v31, %v3232_v13  ;;  %v1429_v0 = vsel %vm1303_vm4, %v1397_v25, %v3233_v61 }
 0x142   : > { %v3241_v60 = vpop.permute.xlu0 %3240  ;;  %v1475_v21 = vpack.c.bf16 %v1429_v0, %v1428_v57  ;;  %v1269_v18 = vsel %vm1237_vm2, %v3894_v6, %v3248_v54  ;;  %v1268_v56 = vsel %vm1237_vm2, %v3892_v46, %v3247_v37  ;;  %v4364_v57 = vld [vmem:[%s4563_s2] ss:$0 sm:$0xff] }
 0x143   : > { %v3256_v62 = vpop.permute.xlu1 %3255  ;;  %v3243_v48 = vunpack.i.h.bf16 %v3241_v60  ;;  %v3242_v49 = vunpack.i.l.bf16 %v3241_v60 }
 0x144   : > { %1816 = vmatprep.mubr.bf16.mxu0 %v1475_v21  ;;  %v3258_v39 = vunpack.i.h.bf16 %v3256_v62  ;;  %v3257_v41 = vunpack.i.l.bf16 %v3256_v62  ;;  %v4370_v21 = vld [vmem:[%s4564_s3] ss:$0 sm:$0xff] }
 0x145   : > { %1817 = vmatmul.mubr.bf16.gmra.mrb[56].mxu0 %v1474_v11  ;;  %v1367_v26 = vsel %vm1237_vm2, %v4058_v23, %v3243_v48  ;;  %v1366_v10 = vsel %vm1237_vm2, %v4055_v35, %v3242_v49 }
 0x146   : > { %v3251_v53 = vpop.permute.xlu0 %3250  ;;  %v1301_v50 = vsel %vm1270_vm3, %v1268_v56, %v3257_v41  ;;  %v1302_v6 = vsel %vm1270_vm3, %v1269_v18, %v3258_v39 }
 0x147   : > { %v3266_v42 = vpop.permute.xlu1 %3265  ;;  %v3253_v22 = vunpack.i.h.bf16 %v3251_v53  ;;  %v3252_v9 = vunpack.i.l.bf16 %v3251_v53 }
 0x148   : > { %v3268_v8 = vunpack.i.h.bf16 %v3266_v42  ;;  %v3267_v29 = vunpack.i.l.bf16 %v3266_v42 }
 0x149   : > { %v1398_v51 = vsel %vm1270_vm3, %v1366_v10, %v3252_v9  ;;  %v1399_v40 = vsel %vm1270_vm3, %v1367_v26, %v3253_v22 }
 0x14a   : > { %v3261_v3 = vpop.permute.xlu0 %3260  ;;  %v1334_v38 = vsel %vm1303_vm4, %v1301_v50, %v3267_v29  ;;  %v1335_v59 = vsel %vm1303_vm4, %v1302_v6, %v3268_v8 }
 0x14b   : > { %v3263_v28 = vunpack.i.h.bf16 %v3261_v3  ;;  %v3262_v46 = vunpack.i.l.bf16 %v3261_v3  ;;  %v1477_v24 = vpack.c.bf16 %v1335_v59, %v1334_v38 }
 0x14d   : > { %v1430_v23 = vsel %vm1303_vm4, %v1398_v51, %v3262_v46  ;;  %v1431_v2 = vsel %vm1303_vm4, %v1399_v40, %v3263_v28 }
 0x14e   : > { %v1478_v35 = vpack.c.bf16 %v1431_v2, %v1430_v23 }
 0x150   : > { %1824 = vmatprep.mubr.bf16.mxu0 %v1478_v35 }
 0x151   : > { %1825 = vmatmul.mubr.bf16.gmra.mrb[60].mxu0 %v1477_v24  ;;  %v4345_v20 = vpop.f32.mrb[16].mxu1 }
 0x152   : > { %v4347_v33 = vpop.f32.mrb[17].mxu1 }
 0x153   : > { %v4349_v5 = vpop.f32.mrb[18].mxu1 }
 0x154   : > { %v4351_v1 = vpop.f32.mrb[19].mxu1 }
 0x16c   : > { %v4353_v16 = vpop.f32.mrb[20].mxu1 }
 0x16d   : > { %v4355_v45 = vpop.f32.mrb[21].mxu1 }
 0x16e   : > { %v4357_v61 = vpop.f32.mrb[22].mxu1 }
 0x16f   : > { %v4359_v13 = vpop.f32.mrb[23].mxu1 }
 0x170   : > { %v2555_v17 = vpop.f32.mrb[0].mxu0 }
 0x171   : > { %v2556_v31 = vpop.f32.mrb[1].mxu0 }
 0x172   : > { %v2557_v25 = vadd.f32 %v2556_v31, %v2555_v17  ;;  %v2558_v47 = vpop.f32.mrb[2].mxu0 }
 0x173   : > { %v2559_v15 = vpop.f32.mrb[3].mxu0 }
 0x174   : > { %v2560_v0 = vadd.f32 %v2559_v15, %v2558_v47  ;;  %v1868_v60 = vadd.f32 %v2557_v25, %v4255_v32 }
 0x176   : > { %v2001_v54 = vmul.f32 %v4364_v57, %v1868_v60  ;;  %v1871_v37 = vadd.f32 %v2560_v0, %v4265_v44 }
 0x178   : > { %v2040_v62 = vadd.f32 %v4370_v21, %v2001_v54  ;;  %v2002_v11 = vmul.f32 %v4364_v57, %v1871_v37 }
 0x17a   : > { %v2041_v48 = vadd.f32 %v4370_v21, %v2002_v11  ;;  %v2072_v49 = vmax.f32 %v2040_v62, 0.0 }
 0x17c   : > { %v2073_v53 = vmax.f32 %v2041_v48, 0.0  ;;  %v2561_v18 = vpop.f32.mrb[4].mxu0 }
 0x17d   : > { %v2562_v56 = vpop.f32.mrb[5].mxu0 }
 0x17e   : > { %v2563_v32 = vadd.f32 %v2562_v56, %v2561_v18  ;;  %v2564_v39 = vpop.f32.mrb[6].mxu0  ;;  %v2104_v41 = vpack.c.bf16 %v2073_v53, %v2072_v49 }
 0x17f   : > { %v2565_v42 = vpop.f32.mrb[7].mxu0 }
 0x180   : > { %v1876_v22 = vadd.f32 %v4253_v34, %v2563_v32  ;;  %v2566_v9 = vadd.f32 %v2565_v42, %v2564_v39  ;;  %2745 = vmatprep.mubr.bf16.mxu1 %v2104_v41 }
 0x181   : > { %v4382_v10 = vpop.f32.mrb[24].mxu1 }
 0x182   : > { %v2003_v44 = vmul.f32 %v4364_v57, %v1876_v22  ;;  %v1879_v8 = vadd.f32 %v4261_v19, %v2566_v9  ;;  %v4384_v3 = vpop.f32.mrb[25].mxu1 }
 0x183   : > { %v4387_v6 = vpop.f32.mrb[26].mxu1 }
 0x184   : > { %v2042_v29 = vadd.f32 %v4370_v21, %v2003_v44  ;;  %v2004_v26 = vmul.f32 %v4364_v57, %v1879_v8  ;;  %v4389_v28 = vpop.f32.mrb[27].mxu1 }
 0x186   : > { %v2043_v50 = vadd.f32 %v4370_v21, %v2004_v26  ;;  %v2074_v34 = vmax.f32 %v2042_v29, 0.0 }
 0x188   : > { %v2075_v46 = vmax.f32 %v2043_v50, 0.0  ;;  %v2567_v51 = vpop.f32.mrb[8].mxu0 }
 0x189   : > { %v2568_v40 = vpop.f32.mrb[9].mxu0 }
 0x18a   : > { %v2105_v38 = vpack.c.bf16 %v2075_v46, %v2074_v34  ;;  %v2569_v19 = vadd.f32 %v2568_v40, %v2567_v51  ;;  %v2570_v59 = vpop.f32.mrb[10].mxu0 }
 0x18b   : > { %v2571_v23 = vpop.f32.mrb[11].mxu0 }
 0x18c   : > { %v2572_v2 = vadd.f32 %v2571_v23, %v2570_v59  ;;  %v1884_v35 = vadd.f32 %v2569_v19, %v4275_v63  ;;  %2746 = vmatmul.mubr.bf16.vlgmr.msra.gmra.mrb[32].mxu1 %v2105_v38 }
 0x18e   : > { %v2005_v24 = vmul.f32 %v4364_v57, %v1884_v35  ;;  %v1887_v17 = vadd.f32 %v2572_v2, %v4283_v55 }
 0x190   : > { %v2044_v31 = vadd.f32 %v4370_v21, %v2005_v24  ;;  %v2006_v25 = vmul.f32 %v4364_v57, %v1887_v17 }
 0x192   : > { %v2045_v47 = vadd.f32 %v4370_v21, %v2006_v25  ;;  %v2076_v15 = vmax.f32 %v2044_v31, 0.0 }
 0x194   : > { %v2077_v0 = vmax.f32 %v2045_v47, 0.0  ;;  %v2573_v60 = vpop.f32.mrb[12].mxu0 }
 0x195   : > { %v2574_v54 = vpop.f32.mrb[13].mxu0 }
 0x196   : > { %v2575_v37 = vadd.f32 %v2574_v54, %v2573_v60  ;;  %v2576_v62 = vpop.f32.mrb[14].mxu0  ;;  %v2106_v11 = vpack.c.bf16 %v2077_v0, %v2076_v15 }
 0x197   : > { %v2577_v48 = vpop.f32.mrb[15].mxu0  ;;  %v4402_v32 = vpop.f32.mrb[28].mxu1 }
 0x198   : > { %v1892_v63 = vadd.f32 %v4273_v36, %v2575_v37  ;;  %v2578_v49 = vadd.f32 %v2577_v48, %v2576_v62  ;;  %2749 = vmatprep.mubr.bf16.mxu1 %v2106_v11  ;;  %v4404_v39 = vpop.f32.mrb[29].mxu1 }
 0x199   : > { %v4407_v42 = vpop.f32.mrb[30].mxu1 }
 0x19a   : > { %v2007_v55 = vmul.f32 %v4364_v57, %v1892_v63  ;;  %v1895_v53 = vadd.f32 %v4281_v52, %v2578_v49  ;;  %v4409_v22 = vpop.f32.mrb[31].mxu1 }
 0x19c   : > { %v2008_v18 = vmul.f32 %v4364_v57, %v1895_v53  ;;  %v2046_v56 = vadd.f32 %v4370_v21, %v2007_v55 }
 0x19e   : > { %v2047_v41 = vadd.f32 %v4370_v21, %v2008_v18  ;;  %v2078_v9 = vmax.f32 %v2046_v56, 0.0 }
 0x1a0   : > { %v2579_v36 = vpop.f32.mrb[16].mxu0  ;;  %v2079_v44 = vmax.f32 %v2047_v41, 0.0 }
 0x1a1   : > { %v2580_v8 = vpop.f32.mrb[17].mxu0 }
 0x1a2   : > { %v2581_v29 = vadd.f32 %v2580_v8, %v2579_v36  ;;  %v2582_v52 = vpop.f32.mrb[18].mxu0  ;;  %v2107_v26 = vpack.c.bf16 %v2079_v44, %v2078_v9 }
 0x1a3   : > { %v2583_v50 = vpop.f32.mrb[19].mxu0 }
 0x1a4   : > { %v2584_v34 = vadd.f32 %v2583_v50, %v2582_v52  ;;  %v1900_v46 = vadd.f32 %v2581_v29, %v4299_v4  ;;  %2750 = vmatmul.mubr.bf16.gmra.mrb[36].mxu1 %v2107_v26 }
 0x1a6   : > { %v2009_v51 = vmul.f32 %v4364_v57, %v1900_v46  ;;  %v1903_v40 = vadd.f32 %v2584_v34, %v4307_v43 }
 0x1a8   : > { %v2048_v38 = vadd.f32 %v4370_v21, %v2009_v51  ;;  %v2010_v19 = vmul.f32 %v4364_v57, %v1903_v40 }
 0x1aa   : > { %v2049_v59 = vadd.f32 %v4370_v21, %v2010_v19  ;;  %v2080_v2 = vmax.f32 %v2048_v38, 0.0 }
 0x1ac   : > { %v2585_v23 = vpop.f32.mrb[20].mxu0  ;;  %v2081_v35 = vmax.f32 %v2049_v59, 0.0 }
 0x1ad   : > { %v2586_v24 = vpop.f32.mrb[21].mxu0 }
 0x1ae   : > { %v2587_v17 = vadd.f32 %v2586_v24, %v2585_v23  ;;  %v2588_v31 = vpop.f32.mrb[22].mxu0  ;;  %v2108_v47 = vpack.c.bf16 %v2081_v35, %v2080_v2 }
 0x1af   : > { %v2589_v25 = vpop.f32.mrb[23].mxu0 }
 0x1b0   : > { %v1908_v4 = vadd.f32 %v4297_v30, %v2587_v17  ;;  %v2590_v15 = vadd.f32 %v2589_v25, %v2588_v31  ;;  %2753 = vmatprep.mubr.bf16.mxu1 %v2108_v47 }
 0x1b2   : > { %v2011_v43 = vmul.f32 %v4364_v57, %v1908_v4  ;;  %v1911_v0 = vadd.f32 %v4301_v27, %v2590_v15 }
 0x1b4   : > { %v2012_v60 = vmul.f32 %v4364_v57, %v1911_v0  ;;  %v2050_v54 = vadd.f32 %v4370_v21, %v2011_v43 }
 0x1b6   : > { %v2051_v37 = vadd.f32 %v4370_v21, %v2012_v60  ;;  %v2082_v11 = vmax.f32 %v2050_v54, 0.0 }
 0x1b8   : > { %v2591_v62 = vpop.f32.mrb[24].mxu0  ;;  %v2083_v48 = vmax.f32 %v2051_v37, 0.0 }
 0x1b9   : > { %v2592_v63 = vpop.f32.mrb[25].mxu0 }
 0x1ba   : > { %v2593_v49 = vadd.f32 %v2592_v63, %v2591_v62  ;;  %v2594_v55 = vpop.f32.mrb[26].mxu0  ;;  %v2109_v53 = vpack.c.bf16 %v2083_v48, %v2082_v11 }
 0x1bb   : > { %v2595_v30 = vpop.f32.mrb[27].mxu0 }
 0x1bc   : > { %v2596_v18 = vadd.f32 %v2595_v30, %v2594_v55  ;;  %v1916_v56 = vadd.f32 %v2593_v49, %v4323_v14  ;;  %2754 = vmatmul.mubr.bf16.gmra.mrb[40].mxu1 %v2109_v53 }
 0x1be   : > { %v2013_v27 = vmul.f32 %v4364_v57, %v1916_v56  ;;  %v1919_v41 = vadd.f32 %v2596_v18, %v4327_v12 }
 0x1c0   : > { %v2052_v36 = vadd.f32 %v4370_v21, %v2013_v27  ;;  %v2014_v9 = vmul.f32 %v4364_v57, %v1919_v41 }
 0x1c2   : > { %v2053_v44 = vadd.f32 %v4370_v21, %v2014_v9  ;;  %v2084_v8 = vmax.f32 %v2052_v36, 0.0 }
 0x1c4   : > { %v2085_v29 = vmax.f32 %v2053_v44, 0.0  ;;  %v2597_v52 = vpop.f32.mrb[28].mxu0 }
 0x1c5   : > { %v2598_v26 = vpop.f32.mrb[29].mxu0 }
 0x1c6   : > { %v2599_v50 = vadd.f32 %v2598_v26, %v2597_v52  ;;  %v2600_v34 = vpop.f32.mrb[30].mxu0  ;;  %v2110_v46 = vpack.c.bf16 %v2085_v29, %v2084_v8 }
 0x1c7   : > { %v2601_v51 = vpop.f32.mrb[31].mxu0 }
 0x1c8   : > { %v1924_v14 = vadd.f32 %v4319_v58, %v2599_v50  ;;  %v2602_v40 = vadd.f32 %v2601_v51, %v2600_v34  ;;  %2757 = vmatprep.mubr.bf16.mxu1 %v2110_v46 }
 0x1ca   : > { %v2015_v12 = vmul.f32 %v4364_v57, %v1924_v14  ;;  %v1927_v38 = vadd.f32 %v4325_v7, %v2602_v40 }
 0x1cc   : > { %v2016_v19 = vmul.f32 %v4364_v57, %v1927_v38  ;;  %v2054_v59 = vadd.f32 %v4370_v21, %v2015_v12 }
 0x1ce   : > { %v2055_v23 = vadd.f32 %v4370_v21, %v2016_v19  ;;  %v2086_v35 = vmax.f32 %v2054_v59, 0.0 }
 0x1d0   : > { %v2603_v2 = vpop.f32.mrb[32].mxu0  ;;  %v2087_v24 = vmax.f32 %v2055_v23, 0.0 }
 0x1d1   : > { %v2604_v17 = vpop.f32.mrb[33].mxu0 }
 0x1d2   : > { %v2605_v31 = vadd.f32 %v2604_v17, %v2603_v2  ;;  %v2606_v25 = vpop.f32.mrb[34].mxu0  ;;  %v2111_v47 = vpack.c.bf16 %v2087_v24, %v2086_v35 }
 0x1d3   : > { %v2607_v58 = vpop.f32.mrb[35].mxu0 }
 0x1d4   : > { %v2608_v4 = vadd.f32 %v2607_v58, %v2606_v25  ;;  %v1932_v15 = vadd.f32 %v2605_v31, %v4347_v33  ;;  %2758 = vmatmul.mubr.bf16.gmra.mrb[44].mxu1 %v2111_v47 }
 0x1d6   : > { %v2017_v7 = vmul.f32 %v4364_v57, %v1932_v15  ;;  %v1935_v43 = vadd.f32 %v2608_v4, %v4351_v1 }
 0x1d8   : > { %v2056_v0 = vadd.f32 %v4370_v21, %v2017_v7  ;;  %v2018_v60 = vmul.f32 %v4364_v57, %v1935_v43 }
 0x1da   : > { %v2057_v54 = vadd.f32 %v4370_v21, %v2018_v60  ;;  %v2088_v37 = vmax.f32 %v2056_v0, 0.0 }
 0x1dc   : > { %v2089_v62 = vmax.f32 %v2057_v54, 0.0  ;;  %v2609_v11 = vpop.f32.mrb[36].mxu0 }
 0x1dd   : > { %v2610_v48 = vpop.f32.mrb[37].mxu0 }
 0x1de   : > { %v2611_v63 = vadd.f32 %v2610_v48, %v2609_v11  ;;  %v2612_v49 = vpop.f32.mrb[38].mxu0  ;;  %v2112_v55 = vpack.c.bf16 %v2089_v62, %v2088_v37 }
 0x1df   : > { %v2613_v53 = vpop.f32.mrb[39].mxu0 }
 0x1e0   : > { %v1940_v33 = vadd.f32 %v4345_v20, %v2611_v63  ;;  %v2614_v30 = vadd.f32 %v2613_v53, %v2612_v49  ;;  %2761 = vmatprep.mubr.bf16.mxu1 %v2112_v55 }
 0x1e2   : > { %v2019_v1 = vmul.f32 %v4364_v57, %v1940_v33  ;;  %v1943_v18 = vadd.f32 %v4349_v5, %v2614_v30 }
 0x1e4   : > { %v2020_v56 = vmul.f32 %v4364_v57, %v1943_v18  ;;  %v2058_v27 = vadd.f32 %v4370_v21, %v2019_v1 }
 0x1e6   : > { %v2059_v41 = vadd.f32 %v4370_v21, %v2020_v56  ;;  %v2090_v9 = vmax.f32 %v2058_v27, 0.0 }
 0x1e8   : > { %v2615_v36 = vpop.f32.mrb[40].mxu0  ;;  %v2091_v44 = vmax.f32 %v2059_v41, 0.0 }
 0x1e9   : > { %v2616_v8 = vpop.f32.mrb[41].mxu0 }
 0x1ea   : > { %v2617_v29 = vadd.f32 %v2616_v8, %v2615_v36  ;;  %v2618_v52 = vpop.f32.mrb[42].mxu0  ;;  %v2113_v26 = vpack.c.bf16 %v2091_v44, %v2090_v9 }
 0x1eb   : > { %v2619_v20 = vpop.f32.mrb[43].mxu0 }
 0x1ec   : > { %v2620_v50 = vadd.f32 %v2619_v20, %v2618_v52  ;;  %v1948_v34 = vadd.f32 %v2617_v29, %v4355_v45  ;;  %2762 = vmatmul.mubr.bf16.gmra.mrb[48].mxu1 %v2113_v26 }
 0x1ee   : > { %v2021_v5 = vmul.f32 %v4364_v57, %v1948_v34  ;;  %v1951_v46 = vadd.f32 %v2620_v50, %v4359_v13 }
 0x1f0   : > { %v2060_v51 = vadd.f32 %v4370_v21, %v2021_v5  ;;  %v2022_v14 = vmul.f32 %v4364_v57, %v1951_v46 }
 0x1f2   : > { %v2061_v40 = vadd.f32 %v4370_v21, %v2022_v14  ;;  %v2092_v12 = vmax.f32 %v2060_v51, 0.0 }
 0x1f4   : > { %v2093_v38 = vmax.f32 %v2061_v40, 0.0  ;;  %v2621_v19 = vpop.f32.mrb[44].mxu0 }
 0x1f5   : > { %v2622_v59 = vpop.f32.mrb[45].mxu0 }
 0x1f6   : > { %v2623_v23 = vadd.f32 %v2622_v59, %v2621_v19  ;;  %v2624_v2 = vpop.f32.mrb[46].mxu0  ;;  %v2114_v35 = vpack.c.bf16 %v2093_v38, %v2092_v12 }
 0x1f7   : > { %v2625_v24 = vpop.f32.mrb[47].mxu0 }
 0x1f8   : > { %v1956_v45 = vadd.f32 %v4353_v16, %v2623_v23  ;;  %v2626_v17 = vadd.f32 %v2625_v24, %v2624_v2  ;;  %2765 = vmatprep.mubr.bf16.mxu1 %v2114_v35 }
 0x1fa   : > { %v2023_v13 = vmul.f32 %v4364_v57, %v1956_v45  ;;  %v1959_v31 = vadd.f32 %v4357_v61, %v2626_v17 }
 0x1fc   : > { %v2024_v25 = vmul.f32 %v4364_v57, %v1959_v31  ;;  %v2062_v47 = vadd.f32 %v4370_v21, %v2023_v13 }
 0x1fe   : > { %v2063_v58 = vadd.f32 %v4370_v21, %v2024_v25  ;;  %v2094_v15 = vmax.f32 %v2062_v47, 0.0 }
 0x200   : > { %v2627_v4 = vpop.f32.mrb[48].mxu0  ;;  %v2095_v7 = vmax.f32 %v2063_v58, 0.0 }
 0x201   : > { %v2628_v43 = vpop.f32.mrb[49].mxu0 }
 0x202   : > { %v2629_v0 = vadd.f32 %v2628_v43, %v2627_v4  ;;  %v2630_v60 = vpop.f32.mrb[50].mxu0  ;;  %v2115_v54 = vpack.c.bf16 %v2095_v7, %v2094_v15 }
 0x203   : > { %v2631_v16 = vpop.f32.mrb[51].mxu0 }
 0x204   : > { %v2632_v37 = vadd.f32 %v2631_v16, %v2630_v60  ;;  %v1964_v62 = vadd.f32 %v2629_v0, %v4384_v3  ;;  %2766 = vmatmul.mubr.bf16.gmra.mrb[52].mxu1 %v2115_v54 }
 0x206   : > { %v2025_v61 = vmul.f32 %v4364_v57, %v1964_v62  ;;  %v1967_v11 = vadd.f32 %v2632_v37, %v4389_v28 }
 0x208   : > { %v2064_v48 = vadd.f32 %v4370_v21, %v2025_v61  ;;  %v2026_v63 = vmul.f32 %v4364_v57, %v1967_v11 }
 0x20a   : > { %v2065_v49 = vadd.f32 %v4370_v21, %v2026_v63  ;;  %v2096_v55 = vmax.f32 %v2064_v48, 0.0 }
 0x20c   : > { %v2097_v53 = vmax.f32 %v2065_v49, 0.0  ;;  %v2633_v33 = vpop.f32.mrb[52].mxu0 }
 0x20d   : > { %v2634_v30 = vpop.f32.mrb[53].mxu0 }
 0x20e   : > { %v2635_v1 = vadd.f32 %v2634_v30, %v2633_v33  ;;  %v2636_v18 = vpop.f32.mrb[54].mxu0  ;;  %v2116_v56 = vpack.c.bf16 %v2097_v53, %v2096_v55 }
 0x20f   : > { %v2637_v27 = vpop.f32.mrb[55].mxu0 }
 0x210   : > { %v1972_v3 = vadd.f32 %v4382_v10, %v2635_v1  ;;  %v2638_v41 = vadd.f32 %v2637_v27, %v2636_v18  ;;  %2769 = vmatprep.mubr.bf16.mxu1 %v2116_v56 }
 0x212   : > { %v2027_v28 = vmul.f32 %v4364_v57, %v1972_v3  ;;  %v1975_v36 = vadd.f32 %v4387_v6, %v2638_v41 }
 0x214   : > { %v2028_v9 = vmul.f32 %v4364_v57, %v1975_v36  ;;  %v2066_v44 = vadd.f32 %v4370_v21, %v2027_v28 }
 0x216   : > { %v2067_v8 = vadd.f32 %v4370_v21, %v2028_v9  ;;  %v2098_v52 = vmax.f32 %v2066_v44, 0.0 }
 0x218   : > { %v2639_v29 = vpop.f32.mrb[56].mxu0  ;;  %v2099_v26 = vmax.f32 %v2067_v8, 0.0 }
 0x219   : > { %v2640_v20 = vpop.f32.mrb[57].mxu0 }
 0x21a   : > { %v2641_v50 = vadd.f32 %v2640_v20, %v2639_v29  ;;  %v2642_v34 = vpop.f32.mrb[58].mxu0  ;;  %v2117_v5 = vpack.c.bf16 %v2099_v26, %v2098_v52 }
 0x21b   : > { %v2643_v10 = vpop.f32.mrb[59].mxu0 }
 0x21c   : > { %v2644_v46 = vadd.f32 %v2643_v10, %v2642_v34  ;;  %v1980_v51 = vadd.f32 %v2641_v50, %v4404_v39  ;;  %2770 = vmatmul.mubr.bf16.gmra.mrb[56].mxu1 %v2117_v5 }
 0x21e   : > { %v2029_v6 = vmul.f32 %v4364_v57, %v1980_v51  ;;  %v1983_v14 = vadd.f32 %v2644_v46, %v4409_v22 }
 0x220   : > { %v2068_v40 = vadd.f32 %v4370_v21, %v2029_v6  ;;  %v2030_v12 = vmul.f32 %v4364_v57, %v1983_v14 }
 0x222   : > { %v2069_v38 = vadd.f32 %v4370_v21, %v2030_v12  ;;  %v2100_v19 = vmax.f32 %v2068_v40, 0.0 }
 0x224   : > { %v2101_v59 = vmax.f32 %v2069_v38, 0.0  ;;  %v2645_v23 = vpop.f32.mrb[60].mxu0 }
 0x225   : > { %v2646_v2 = vpop.f32.mrb[61].mxu0 }
 0x226   : > { %v2647_v35 = vadd.f32 %v2646_v2, %v2645_v23  ;;  %v2648_v24 = vpop.f32.mrb[62].mxu0  ;;  %v2118_v45 = vpack.c.bf16 %v2101_v59, %v2100_v19 }
 0x227   : > { %v2649_v39 = vpop.f32.mrb[63].mxu0 }
 0x228   : > { %v1988_v17 = vadd.f32 %v4402_v32, %v2647_v35  ;;  %v2650_v13 = vadd.f32 %v2649_v39, %v2648_v24  ;;  %2773 = vmatprep.mubr.bf16.mxu1 %v2118_v45  ;;  %v4487_v32 = vld [vmem:[%s4566_s5] ss:$0 sm:$0xff] }
 0x22a   : > { %v2031_v22 = vmul.f32 %v4364_v57, %v1988_v17  ;;  %v1991_v31 = vadd.f32 %v4407_v42, %v2650_v13 }
 0x22c   : > { %v2032_v25 = vmul.f32 %v4364_v57, %v1991_v31  ;;  %v2070_v47 = vadd.f32 %v4370_v21, %v2031_v22 }
 0x22e   : > { %v2071_v58 = vadd.f32 %v4370_v21, %v2032_v25  ;;  %v2102_v4 = vmax.f32 %v2070_v47, 0.0 }
 0x230   : > { %v2103_v15 = vmax.f32 %v2071_v58, 0.0 }
 0x232   : > { %v2119_v7 = vpack.c.bf16 %v2103_v15, %v2102_v4 }
 0x234   : > { %2774 = vmatmul.mubr.bf16.gmra.mrb[60].mxu1 %v2119_v7 }
 0x25f   : > { %v2747_v57 = vpop.f32.mrb[32].mxu1 }
 0x260   : > { %v2234_v21 = vadd.f32 %v2747_v57, %v4487_v32  ;;  %v2225_v42 = vpop.f32.mrb[33].mxu1 }
 0x261   : > { %v2226_v43 = vadd.f32 %v4487_v32, %v2225_v42  ;;  %v2748_v0 = vpop.f32.mrb[34].mxu1 }
 0x262   : > { %2354 = vst [vmem:[%s4492_s18 + $0x10] sm:$0xff] %v2234_v21  ;;  %v2237_v60 = vadd.f32 %v2748_v0, %v4487_v32  ;;  %v2228_v54 = vpop.f32.mrb[35].mxu1 }
 0x263   : > { %2352 = vst [vmem:[%s4492_s18] sm:$0xff] %v2226_v43  ;;  %v2229_v16 = vadd.f32 %v4487_v32, %v2228_v54 }
 0x264   : > { %2355 = vst [vmem:[%s4492_s18 + $0x18] sm:$0xff] %v2237_v60 }
 0x265   : > { %2353 = vst [vmem:[%s4492_s18 + $0x8] sm:$0xff] %v2229_v16 }
 0x277   : > { %v2751_v37 = vpop.f32.mrb[36].mxu1 }
 0x278   : > { %v2250_v62 = vadd.f32 %v2751_v37, %v4487_v32  ;;  %v2241_v61 = vpop.f32.mrb[37].mxu1 }
 0x279   : > { %v2242_v11 = vadd.f32 %v4487_v32, %v2241_v61  ;;  %v2752_v48 = vpop.f32.mrb[38].mxu1 }
 0x27a   : > { %2358 = vst [vmem:[%s4492_s18 + $0x30] sm:$0xff] %v2250_v62  ;;  %v2253_v63 = vadd.f32 %v2752_v48, %v4487_v32  ;;  %v2244_v49 = vpop.f32.mrb[39].mxu1 }
 0x27b   : > { %2356 = vst [vmem:[%s4492_s18 + $0x20] sm:$0xff] %v2242_v11  ;;  %v2245_v55 = vadd.f32 %v4487_v32, %v2244_v49 }
 0x27c   : > { %2359 = vst [vmem:[%s4492_s18 + $0x38] sm:$0xff] %v2253_v63 }
 0x27d   : > { %2357 = vst [vmem:[%s4492_s18 + $0x28] sm:$0xff] %v2245_v55 }
 0x28f   : > { %v2755_v53 = vpop.f32.mrb[40].mxu1 }
 0x290   : > { %v2266_v33 = vadd.f32 %v2755_v53, %v4487_v32  ;;  %v2257_v30 = vpop.f32.mrb[41].mxu1 }
 0x291   : > { %v2258_v1 = vadd.f32 %v4487_v32, %v2257_v30  ;;  %v2756_v18 = vpop.f32.mrb[42].mxu1 }
 0x292   : > { %2362 = vst [vmem:[%s4492_s18 + $0x50] sm:$0xff] %v2266_v33  ;;  %v2269_v56 = vadd.f32 %v2756_v18, %v4487_v32  ;;  %v2260_v27 = vpop.f32.mrb[43].mxu1 }
 0x293   : > { %2360 = vst [vmem:[%s4492_s18 + $0x40] sm:$0xff] %v2258_v1  ;;  %v2261_v3 = vadd.f32 %v4487_v32, %v2260_v27 }
 0x294   : > { %2363 = vst [vmem:[%s4492_s18 + $0x58] sm:$0xff] %v2269_v56 }
 0x295   : > { %2361 = vst [vmem:[%s4492_s18 + $0x48] sm:$0xff] %v2261_v3 }
 0x2a7   : > { %v2759_v41 = vpop.f32.mrb[44].mxu1 }
 0x2a8   : > { %v2282_v28 = vadd.f32 %v2759_v41, %v4487_v32  ;;  %v2273_v36 = vpop.f32.mrb[45].mxu1 }
 0x2a9   : > { %v2274_v9 = vadd.f32 %v4487_v32, %v2273_v36  ;;  %v2760_v44 = vpop.f32.mrb[46].mxu1 }
 0x2aa   : > { %2366 = vst [vmem:[%s4492_s18 + $0x70] sm:$0xff] %v2282_v28  ;;  %v2285_v8 = vadd.f32 %v2760_v44, %v4487_v32  ;;  %v2276_v29 = vpop.f32.mrb[47].mxu1 }
 0x2ab   : > { %2364 = vst [vmem:[%s4492_s18 + $0x60] sm:$0xff] %v2274_v9  ;;  %v2277_v52 = vadd.f32 %v4487_v32, %v2276_v29 }
 0x2ac   : > { %2367 = vst [vmem:[%s4492_s18 + $0x78] sm:$0xff] %v2285_v8 }
 0x2ad   : > { %2365 = vst [vmem:[%s4492_s18 + $0x68] sm:$0xff] %v2277_v52 }
 0x2bf   : > { %v2763_v26 = vpop.f32.mrb[48].mxu1 }
 0x2c0   : > { %v2298_v20 = vadd.f32 %v2763_v26, %v4487_v32  ;;  %v2289_v50 = vpop.f32.mrb[49].mxu1 }
 0x2c1   : > { %v2290_v34 = vadd.f32 %v4487_v32, %v2289_v50  ;;  %v2764_v5 = vpop.f32.mrb[50].mxu1 }
 0x2c2   : > { %2370 = vst [vmem:[%s4492_s18 + $0x90] sm:$0xff] %v2298_v20  ;;  %v2301_v10 = vadd.f32 %v2764_v5, %v4487_v32  ;;  %v2292_v46 = vpop.f32.mrb[51].mxu1 }
 0x2c3   : > { %2368 = vst [vmem:[%s4492_s18 + $0x80] sm:$0xff] %v2290_v34  ;;  %v2293_v51 = vadd.f32 %v4487_v32, %v2292_v46 }
 0x2c4   : > { %2371 = vst [vmem:[%s4492_s18 + $0x98] sm:$0xff] %v2301_v10 }
 0x2c5   : > { %2369 = vst [vmem:[%s4492_s18 + $0x88] sm:$0xff] %v2293_v51 }
 0x2d7   : > { %v2767_v6 = vpop.f32.mrb[52].mxu1 }
 0x2d8   : > { %v2314_v14 = vadd.f32 %v2767_v6, %v4487_v32  ;;  %v2305_v40 = vpop.f32.mrb[53].mxu1 }
 0x2d9   : > { %v2306_v12 = vadd.f32 %v4487_v32, %v2305_v40  ;;  %v2768_v38 = vpop.f32.mrb[54].mxu1 }
 0x2da   : > { %2374 = vst [vmem:[%s4492_s18 + $0xb0] sm:$0xff] %v2314_v14  ;;  %v2317_v19 = vadd.f32 %v2768_v38, %v4487_v32  ;;  %v2308_v59 = vpop.f32.mrb[55].mxu1 }
 0x2db   : > { %2372 = vst [vmem:[%s4492_s18 + $0xa0] sm:$0xff] %v2306_v12  ;;  %v2309_v23 = vadd.f32 %v4487_v32, %v2308_v59 }
 0x2dc   : > { %2375 = vst [vmem:[%s4492_s18 + $0xb8] sm:$0xff] %v2317_v19 }
 0x2dd   : > { %2373 = vst [vmem:[%s4492_s18 + $0xa8] sm:$0xff] %v2309_v23 }
 0x2ef   : > { %v2771_v2 = vpop.f32.mrb[56].mxu1 }
 0x2f0   : > { %v2330_v35 = vadd.f32 %v2771_v2, %v4487_v32  ;;  %v2321_v24 = vpop.f32.mrb[57].mxu1 }
 0x2f1   : > { %v2322_v45 = vadd.f32 %v4487_v32, %v2321_v24  ;;  %v2772_v39 = vpop.f32.mrb[58].mxu1 }
 0x2f2   : > { %2378 = vst [vmem:[%s4492_s18 + $0xd0] sm:$0xff] %v2330_v35  ;;  %v2333_v17 = vadd.f32 %v2772_v39, %v4487_v32  ;;  %v2324_v13 = vpop.f32.mrb[59].mxu1 }
 0x2f3   : > { %2376 = vst [vmem:[%s4492_s18 + $0xc0] sm:$0xff] %v2322_v45  ;;  %v2325_v22 = vadd.f32 %v4487_v32, %v2324_v13 }
 0x2f4   : > { %2379 = vst [vmem:[%s4492_s18 + $0xd8] sm:$0xff] %v2333_v17 }
 0x2f5   : > { %2377 = vst [vmem:[%s4492_s18 + $0xc8] sm:$0xff] %v2325_v22 }
 0x307   : > { %v2775_v31 = vpop.f32.mrb[60].mxu1 }
 0x308   : > { %v2346_v25 = vadd.f32 %v2775_v31, %v4487_v32  ;;  %v2337_v47 = vpop.f32.mrb[61].mxu1 }
 0x309   : > { %v2338_v58 = vadd.f32 %v4487_v32, %v2337_v47  ;;  %v2776_v4 = vpop.f32.mrb[62].mxu1 }
 0x30a   : > { %2382 = vst [vmem:[%s4492_s18 + $0xf0] sm:$0xff] %v2346_v25  ;;  %v2349_v15 = vadd.f32 %v2776_v4, %v4487_v32  ;;  %v2340_v7 = vpop.f32.mrb[63].mxu1 }
 0x30b   : > { %2380 = vst [vmem:[%s4492_s18 + $0xe0] sm:$0xff] %v2338_v58  ;;  %v2341_v57 = vadd.f32 %v4487_v32, %v2340_v7 }
 0x30c   : > { %2383 = vst [vmem:[%s4492_s18 + $0xf8] sm:$0xff] %v2349_v15 }
 0x30d   : > { %2381 = vst [vmem:[%s4492_s18 + $0xe8] sm:$0xff] %v2341_v57 }
 0x30e PF: > { %s16_s21 = sadd.s32 1, %s3301_s21  }
 0x30f   : > { %p13_p4 = scmp.ge.s32.totalorder %s16_s21, 4  }
 0x311   :  { %15 = sbr.rel (!%p13_p4) target bundleno = 1 (0x1), region = 74 }

</bundles_post_ra>
